<compile_context>
chip_gen: v5e
topology: v5e:2x2
jax: 0.10.0
libtpu: 0.0.40
codegen_flags: <defaults>
</compile_context>

<pallas_src>
import math

import numpy as np
import jax
import jax.numpy as jnp
from jax.experimental import pallas as pl
from jax.experimental.pallas import tpu as pltpu

# ---------------- model hyper-parameters (module __init__ / fit) -------------
HIDDEN = 32          # hidden width of sig_net / mu_net
N_FLOWS = 4          # number of coupling bijectors
FLIP = True          # RealNVP(flip=True) -> flips = [False, True, False, True]
FLIPS = [bool(i % 2) if FLIP else False for i in range(N_FLOWS)]

B = 16               # batch size (rows of X after reshape(-1, d))
D = 8                # d = prod(individual_shape)
K = D // 2           # k = floor(d / 2)

H2 = 2 * HIDDEN      # fused sig|mu hidden width
K2 = 2 * K           # fused sig|mu output width
OUT_W = D + 2        # packed output rows: [z (D) | log_pz (1) | log_jacob (1)]

# Single parameter slab layout (lane-dense, one DMA stream):
#   rows [0, 2H)           lanes [i*(K+1), i*(K+1)+K) : W1^T of flow i (sig rows 0:H, mu rows H:2H)
#                          lane   i*(K+1)+K           : b1 column of flow i
#   rows [2H + i*2K, +2K)  lanes [0, 2H)              : block-diag W2^T of flow i
#                          lane   2H                  : b2 column of flow i
SLAB_ROWS = H2 + N_FLOWS * K2     # 96
SLAB_LANES = 128

LOG_2PI = math.log(2.0 * math.pi)


# ------------------------------- Pallas kernel -------------------------------
def realnvp_kernel(x_ref, p_ref, out_ref):
    """Fused forward pass of the whole RealNVP flow stack, batch-on-lanes.

    x_ref  : (D, TB)               input rows, feature-major (batch on lanes)
    p_ref  : (SLAB_ROWS, 128)      single packed parameter slab (see layout above)
    out_ref: (D + 2, TB)           [z ; log_pz ; log_jacob]
    """
    xa = x_ref[:K, :]                      # (K, TB) first feature half
    xb = x_ref[K:, :]                      # (K, TB) second feature half
    tb = xa.shape[1]

    lj_rows = jnp.zeros((K, tb), jnp.float32)   # per-row log-jacobian accumulator

    # n_flows is small and static -> unrolled Python loop.
    for i, flip in enumerate(FLIPS):
        cond = xb if flip else xa          # conditioning half
        tin = xa if flip else xb           # half being transformed

        base = i * (K + 1)
        w1 = p_ref[0:H2, base:base + K]                # (2H, K)  [W1s^T ; W1m^T]
        b1 = p_ref[0:H2, base + K:base + K + 1]        # (2H, 1)
        r0 = H2 + i * K2
        w2 = p_ref[r0:r0 + K2, 0:H2]                   # (2K, 2H) block-diag [W2s^T 0; 0 W2m^T]
        b2 = p_ref[r0:r0 + K2, H2:H2 + 1]              # (2K, 1)

        # First layer: contraction depth K=4 -> unrolled VPU multiply-add
        # (keeps the MXU off the critical path for this layer).
        h_pre = jnp.broadcast_to(b1, (H2, tb))
        for kk in range(K):
            h_pre = h_pre + w1[:, kk:kk + 1] * cond[kk:kk + 1, :]
        h = jax.nn.sigmoid(h_pre)                      # (2H, TB)

        # Second layer: one block-diagonal MXU dot -> rows 0:K = sig, K:2K = mu
        # (already row-aligned with tin; no cross-lane rotate needed).
        sm = jnp.dot(w2, h, preferred_element_type=jnp.float32) + b2   # (2K, TB)
        sig = sm[:K, :]
        mu = sm[K:, :]

        tout = tin * jnp.exp(sig) + mu                 # affine coupling

        if flip:
            xa = tout              # flip: transformed half lands in slot 1
        else:
            xb = tout              # no flip: transformed half lands in slot 2

        lj_rows = lj_rows + sig    # defer the cross-sublane reduce to the end

    # z_hat = [xa ; xb]; base-dist (standard normal, dim D) log-prob of it.
    sq = jnp.sum(xa * xa + xb * xb, axis=0, keepdims=True)       # (1, TB)
    log_pz = -0.5 * sq - 0.5 * D * LOG_2PI
    lj = jnp.sum(lj_rows, axis=0, keepdims=True)                 # (1, TB)

    # Build the whole result in registers and write it with a single store.
    out_ref[...] = jnp.concatenate([xa, xb, log_pz, lj], axis=0)


# --------------------------- parameter packing -------------------------------
def pack_params(params):
    """Pack the 10 per-flow MLP tensors into ONE lane-dense (96, 128) slab.

    Done once, outside the jitted forward path.
    """
    slab = np.zeros((SLAB_ROWS, SLAB_LANES), np.float32)
    for i in range(N_FLOWS):
        w1 = np.concatenate([np.asarray(params["w1s"][i]).T,
                             np.asarray(params["w1m"][i]).T], axis=0)    # (2H, K)
        b1 = np.concatenate([np.asarray(params["b1s"][i]).T,
                             np.asarray(params["b1m"][i]).T], axis=0)    # (2H, 1)
        base = i * (K + 1)
        slab[0:H2, base:base + K] = w1
        slab[0:H2, base + K:base + K + 1] = b1

        r0 = H2 + i * K2
        slab[r0:r0 + K, 0:HIDDEN] = np.asarray(params["w2s"][i]).T        # (K, H)
        slab[r0 + K:r0 + K2, HIDDEN:H2] = np.asarray(params["w2m"][i]).T  # (K, H)
        b2 = np.concatenate([np.asarray(params["b2s"][i]).T,
                             np.asarray(params["b2m"][i]).T], axis=0)     # (2K, 1)
        slab[r0:r0 + K2, H2:H2 + 1] = b2
    return jnp.asarray(slab)


# --------------------------------- wrapper -----------------------------------
def _choose_tb(batch):
    """Batch tile width (lanes).  Non-full tiles must be 128-multiples."""
    if batch % 128 != 0:
        return batch           # single full-array tile satisfies the (8,128) rule
    tb = batch
    # Cap the tile so double-buffered in/out blocks stay tiny in VMEM (v7x has
    # only 64 MiB physical) and grid >= 2 can shard across both v7x TensorCores.
    while tb > 2048 and tb % 2 == 0 and (tb // 2) % 128 == 0:
        tb //= 2
    return tb


def realnvp_forward(x, param_slab):
    """x: (B, D) float32 -> (z (B, D), log_pz (B,), log_jacob (B,))."""
    batch, d = x.shape
    assert d == D
    tb = _choose_tb(batch)
    grid = (batch // tb,)

    xt = x.T                                   # (D, B) feature-major, batch on lanes

    out = pl.pallas_call(
        realnvp_kernel,
        out_shape=jax.ShapeDtypeStruct((OUT_W, batch), jnp.float32),
        grid=grid,
        in_specs=[
            pl.BlockSpec((D, tb), lambda i: (0, i)),                    # x^T
            pl.BlockSpec((SLAB_ROWS, SLAB_LANES), lambda i: (0, 0)),    # param slab
        ],
        out_specs=pl.BlockSpec((OUT_W, tb), lambda i: (0, i)),
        compiler_params=pltpu.CompilerParams(dimension_semantics=("parallel",)),
    )(xt, param_slab)

    z = out[:D, :].T
    log_pz = out[D, :]
    log_jacob = out[D + 1, :]
    return z, log_pz, log_jacob


# --------------------------- pure-JAX reference ------------------------------
def realnvp_reference(x, params):
    lj = jnp.zeros((x.shape[0],), jnp.float32)
    for i, flip in enumerate(FLIPS):
        x1, x2 = x[:, :K], x[:, K:]
        if flip:
            x1, x2 = x2, x1
        h_s = jax.nn.sigmoid(x1 @ params["w1s"][i] + params["b1s"][i])
        sig = h_s @ params["w2s"][i] + params["b2s"][i]
        h_m = jax.nn.sigmoid(x1 @ params["w1m"][i] + params["b1m"][i])
        mu = h_m @ params["w2m"][i] + params["b2m"][i]
        z1, z2 = x1, x2 * jnp.exp(sig) + mu
        if flip:
            z1, z2 = z2, z1
        x = jnp.concatenate([z1, z2], axis=-1)
        lj = lj + jnp.sum(sig, axis=-1)
    log_pz = -0.5 * jnp.sum(x * x, axis=-1) - 0.5 * D * LOG_2PI
    return x, log_pz, lj


# ----------------------------------- main ------------------------------------
def init_params(key):
    """Deterministic synthetic parameters (shapes from SpectralFilter MLPs)."""
    ks = jax.random.split(key, 8)
    scale = 0.1
    shape_w1 = (N_FLOWS, K, HIDDEN)
    shape_b1 = (N_FLOWS, 1, HIDDEN)
    shape_w2 = (N_FLOWS, HIDDEN, K)
    shape_b2 = (N_FLOWS, 1, K)
    return dict(
        w1s=scale * jax.random.normal(ks[0], shape_w1, jnp.float32),
        b1s=scale * jax.random.normal(ks[1], shape_b1, jnp.float32),
        w2s=scale * jax.random.normal(ks[2], shape_w2, jnp.float32),
        b2s=scale * jax.random.normal(ks[3], shape_b2, jnp.float32),
        w1m=scale * jax.random.normal(ks[4], shape_w1, jnp.float32),
        b1m=scale * jax.random.normal(ks[5], shape_b1, jnp.float32),
        w2m=scale * jax.random.normal(ks[6], shape_w2, jnp.float32),
        b2m=scale * jax.random.normal(ks[7], shape_b2, jnp.float32),
    )


if __name__ == "__main__":
    key = jax.random.PRNGKey(0)
    k_x, k_p = jax.random.split(key)
    x = jax.random.normal(k_x, (B, D), jnp.float32)
    params = init_params(k_p)

    # Pack the 10 tiny parameter tensors into one slab, once, outside the jit.
    param_slab = jax.block_until_ready(pack_params(params))

    fwd = jax.jit(realnvp_forward)
    z, log_pz, log_jacob = fwd(x, param_slab)
    jax.block_until_ready((z, log_pz, log_jacob))

    z_ref, log_pz_ref, lj_ref = realnvp_reference(x, params)
    assert z.shape == (B, D) and log_pz.shape == (B,) and log_jacob.shape == (B,)
    assert jnp.allclose(z, z_ref, rtol=1e-5, atol=1e-5)
    assert jnp.allclose(log_pz, log_pz_ref, rtol=1e-5, atol=1e-5)
    assert jnp.allclose(log_jacob, lj_ref, rtol=1e-5, atol=1e-5)

    print("KERNEL_OK")
</pallas_src>

<mosaic_0001>
module attributes {stable_mosaic.version = 11 : i64} {
  func.func @realnvp_kernel(%arg0: i32, %arg1: memref<8x16xf32, #tpu.memory_space<vmem>>, %arg2: memref<96x128xf32, #tpu.memory_space<vmem>>, %arg3: memref<10x16xf32, #tpu.memory_space<vmem>>) attributes {dimension_semantics = [#tpu.dimension_semantics<parallel>], iteration_bounds = array<i64: 1>, scalar_prefetch = 0 : i64, scratch_operands = 0 : i64, tpu.core_type = #tpu.core_type<tc>, window_params = [{transform_indices = @transform_0, window_bounds = array<i64: 8, 16>}, {pipeline_mode = #tpu.pipeline_mode<synchronous>, transform_indices = @transform_1, window_bounds = array<i64: 96, 128>}, {transform_indices = @transform_2, window_bounds = array<i64: 10, 16>}]} {
    %c0 = arith.constant 0 : index
    %c0_0 = arith.constant 0 : index
    %0 = vector.load %arg1[%c0, %c0_0] : memref<8x16xf32, #tpu.memory_space<vmem>>, vector<4x16xf32>
    %c4 = arith.constant 4 : index
    %c0_1 = arith.constant 0 : index
    %1 = vector.load %arg1[%c4, %c0_1] : memref<8x16xf32, #tpu.memory_space<vmem>>, vector<4x16xf32>
    %cst = arith.constant 0.000000e+00 : f32
    %2 = vector.broadcast %cst : f32 to vector<4x16xf32>
    %c0_2 = arith.constant 0 : index
    %c0_3 = arith.constant 0 : index
    %3 = vector.load %arg2[%c0_2, %c0_3] : memref<96x128xf32, #tpu.memory_space<vmem>>, vector<64x4xf32>
    %c0_4 = arith.constant 0 : index
    %c4_5 = arith.constant 4 : index
    %4 = vector.load %arg2[%c0_4, %c4_5] : memref<96x128xf32, #tpu.memory_space<vmem>>, vector<64x1xf32>
    %c64 = arith.constant 64 : index
    %c0_6 = arith.constant 0 : index
    %5 = vector.load %arg2[%c64, %c0_6] : memref<96x128xf32, #tpu.memory_space<vmem>>, vector<8x64xf32>
    %c64_7 = arith.constant 64 : index
    %c64_8 = arith.constant 64 : index
    %6 = vector.load %arg2[%c64_7, %c64_8] : memref<96x128xf32, #tpu.memory_space<vmem>>, vector<8x1xf32>
    %7 = vector.shape_cast %4 : vector<64x1xf32> to vector<64x1xf32>
    %8 = vector.broadcast %7 : vector<64x1xf32> to vector<64x16xf32>
    %9 = vector.extract_strided_slice %3 {offsets = [0, 0], sizes = [64, 1], strides = [1, 1]} : vector<64x4xf32> to vector<64x1xf32>
    %10 = vector.extract_strided_slice %0 {offsets = [0, 0], sizes = [1, 16], strides = [1, 1]} : vector<4x16xf32> to vector<1x16xf32>
    %11 = vector.broadcast %9 : vector<64x1xf32> to vector<64x16xf32>
    %12 = vector.broadcast %10 : vector<1x16xf32> to vector<64x16xf32>
    %13 = arith.mulf %11, %12 : vector<64x16xf32>
    %14 = arith.addf %8, %13 : vector<64x16xf32>
    %15 = vector.extract_strided_slice %3 {offsets = [0, 1], sizes = [64, 1], strides = [1, 1]} : vector<64x4xf32> to vector<64x1xf32>
    %16 = vector.extract_strided_slice %0 {offsets = [1, 0], sizes = [1, 16], strides = [1, 1]} : vector<4x16xf32> to vector<1x16xf32>
    %17 = vector.broadcast %15 : vector<64x1xf32> to vector<64x16xf32>
    %18 = vector.broadcast %16 : vector<1x16xf32> to vector<64x16xf32>
    %19 = arith.mulf %17, %18 : vector<64x16xf32>
    %20 = arith.addf %14, %19 : vector<64x16xf32>
    %21 = vector.extract_strided_slice %3 {offsets = [0, 2], sizes = [64, 1], strides = [1, 1]} : vector<64x4xf32> to vector<64x1xf32>
    %22 = vector.extract_strided_slice %0 {offsets = [2, 0], sizes = [1, 16], strides = [1, 1]} : vector<4x16xf32> to vector<1x16xf32>
    %23 = vector.broadcast %21 : vector<64x1xf32> to vector<64x16xf32>
    %24 = vector.broadcast %22 : vector<1x16xf32> to vector<64x16xf32>
    %25 = arith.mulf %23, %24 : vector<64x16xf32>
    %26 = arith.addf %20, %25 : vector<64x16xf32>
    %27 = vector.extract_strided_slice %3 {offsets = [0, 3], sizes = [64, 1], strides = [1, 1]} : vector<64x4xf32> to vector<64x1xf32>
    %28 = vector.extract_strided_slice %0 {offsets = [3, 0], sizes = [1, 16], strides = [1, 1]} : vector<4x16xf32> to vector<1x16xf32>
    %29 = vector.broadcast %27 : vector<64x1xf32> to vector<64x16xf32>
    %30 = vector.broadcast %28 : vector<1x16xf32> to vector<64x16xf32>
    %31 = arith.mulf %29, %30 : vector<64x16xf32>
    %32 = arith.addf %26, %31 : vector<64x16xf32>
    %33 = arith.negf %32 : vector<64x16xf32>
    %34 = math.exp %33 : vector<64x16xf32>
    %cst_9 = arith.constant 1.000000e+00 : f32
    %35 = vector.broadcast %cst_9 : f32 to vector<64x16xf32>
    %36 = arith.addf %35, %34 : vector<64x16xf32>
    %37 = arith.divf %35, %36 : vector<64x16xf32>
    %cst_10 = arith.constant dense<0.000000e+00> : vector<8x16xf32>
    %38 = tpu.matmul %5, %37, %cst_10 {dimension_numbers = #tpu.dot_dimension_numbers<[1], [0], [0], [1], [0, 0, 1, 1], [], []>} : vector<8x64xf32>, vector<64x16xf32>, vector<8x16xf32> -> vector<8x16xf32>
    %39 = vector.broadcast %6 : vector<8x1xf32> to vector<8x16xf32>
    %40 = arith.addf %38, %39 : vector<8x16xf32>
    %41 = vector.extract_strided_slice %40 {offsets = [0, 0], sizes = [4, 16], strides = [1, 1]} : vector<8x16xf32> to vector<4x16xf32>
    %42 = vector.extract_strided_slice %40 {offsets = [4, 0], sizes = [4, 16], strides = [1, 1]} : vector<8x16xf32> to vector<4x16xf32>
    %43 = math.exp %41 : vector<4x16xf32>
    %44 = arith.mulf %1, %43 : vector<4x16xf32>
    %45 = arith.addf %44, %42 : vector<4x16xf32>
    %46 = arith.addf %2, %41 : vector<4x16xf32>
    %c0_11 = arith.constant 0 : index
    %c5 = arith.constant 5 : index
    %47 = vector.load %arg2[%c0_11, %c5] : memref<96x128xf32, #tpu.memory_space<vmem>>, vector<64x4xf32>
    %c0_12 = arith.constant 0 : index
    %c9 = arith.constant 9 : index
    %48 = vector.load %arg2[%c0_12, %c9] : memref<96x128xf32, #tpu.memory_space<vmem>>, vector<64x1xf32>
    %c72 = arith.constant 72 : index
    %c0_13 = arith.constant 0 : index
    %49 = vector.load %arg2[%c72, %c0_13] : memref<96x128xf32, #tpu.memory_space<vmem>>, vector<8x64xf32>
    %c72_14 = arith.constant 72 : index
    %c64_15 = arith.constant 64 : index
    %50 = vector.load %arg2[%c72_14, %c64_15] : memref<96x128xf32, #tpu.memory_space<vmem>>, vector<8x1xf32>
    %51 = vector.shape_cast %48 : vector<64x1xf32> to vector<64x1xf32>
    %52 = vector.broadcast %51 : vector<64x1xf32> to vector<64x16xf32>
    %53 = vector.extract_strided_slice %47 {offsets = [0, 0], sizes = [64, 1], strides = [1, 1]} : vector<64x4xf32> to vector<64x1xf32>
    %54 = vector.extract_strided_slice %45 {offsets = [0, 0], sizes = [1, 16], strides = [1, 1]} : vector<4x16xf32> to vector<1x16xf32>
    %55 = vector.broadcast %53 : vector<64x1xf32> to vector<64x16xf32>
    %56 = vector.broadcast %54 : vector<1x16xf32> to vector<64x16xf32>
    %57 = arith.mulf %55, %56 : vector<64x16xf32>
    %58 = arith.addf %52, %57 : vector<64x16xf32>
    %59 = vector.extract_strided_slice %47 {offsets = [0, 1], sizes = [64, 1], strides = [1, 1]} : vector<64x4xf32> to vector<64x1xf32>
    %60 = vector.extract_strided_slice %45 {offsets = [1, 0], sizes = [1, 16], strides = [1, 1]} : vector<4x16xf32> to vector<1x16xf32>
    %61 = vector.broadcast %59 : vector<64x1xf32> to vector<64x16xf32>
    %62 = vector.broadcast %60 : vector<1x16xf32> to vector<64x16xf32>
    %63 = arith.mulf %61, %62 : vector<64x16xf32>
    %64 = arith.addf %58, %63 : vector<64x16xf32>
    %65 = vector.extract_strided_slice %47 {offsets = [0, 2], sizes = [64, 1], strides = [1, 1]} : vector<64x4xf32> to vector<64x1xf32>
    %66 = vector.extract_strided_slice %45 {offsets = [2, 0], sizes = [1, 16], strides = [1, 1]} : vector<4x16xf32> to vector<1x16xf32>
    %67 = vector.broadcast %65 : vector<64x1xf32> to vector<64x16xf32>
    %68 = vector.broadcast %66 : vector<1x16xf32> to vector<64x16xf32>
    %69 = arith.mulf %67, %68 : vector<64x16xf32>
    %70 = arith.addf %64, %69 : vector<64x16xf32>
    %71 = vector.extract_strided_slice %47 {offsets = [0, 3], sizes = [64, 1], strides = [1, 1]} : vector<64x4xf32> to vector<64x1xf32>
    %72 = vector.extract_strided_slice %45 {offsets = [3, 0], sizes = [1, 16], strides = [1, 1]} : vector<4x16xf32> to vector<1x16xf32>
    %73 = vector.broadcast %71 : vector<64x1xf32> to vector<64x16xf32>
    %74 = vector.broadcast %72 : vector<1x16xf32> to vector<64x16xf32>
    %75 = arith.mulf %73, %74 : vector<64x16xf32>
    %76 = arith.addf %70, %75 : vector<64x16xf32>
    %77 = arith.negf %76 : vector<64x16xf32>
    %78 = math.exp %77 : vector<64x16xf32>
    %cst_16 = arith.constant 1.000000e+00 : f32
    %79 = vector.broadcast %cst_16 : f32 to vector<64x16xf32>
    %80 = arith.addf %79, %78 : vector<64x16xf32>
    %81 = arith.divf %79, %80 : vector<64x16xf32>
    %cst_17 = arith.constant dense<0.000000e+00> : vector<8x16xf32>
    %82 = tpu.matmul %49, %81, %cst_17 {dimension_numbers = #tpu.dot_dimension_numbers<[1], [0], [0], [1], [0, 0, 1, 1], [], []>} : vector<8x64xf32>, vector<64x16xf32>, vector<8x16xf32> -> vector<8x16xf32>
    %83 = vector.broadcast %50 : vector<8x1xf32> to vector<8x16xf32>
    %84 = arith.addf %82, %83 : vector<8x16xf32>
    %85 = vector.extract_strided_slice %84 {offsets = [0, 0], sizes = [4, 16], strides = [1, 1]} : vector<8x16xf32> to vector<4x16xf32>
    %86 = vector.extract_strided_slice %84 {offsets = [4, 0], sizes = [4, 16], strides = [1, 1]} : vector<8x16xf32> to vector<4x16xf32>
    %87 = math.exp %85 : vector<4x16xf32>
    %88 = arith.mulf %0, %87 : vector<4x16xf32>
    %89 = arith.addf %88, %86 : vector<4x16xf32>
    %90 = arith.addf %46, %85 : vector<4x16xf32>
    %c0_18 = arith.constant 0 : index
    %c10 = arith.constant 10 : index
    %91 = vector.load %arg2[%c0_18, %c10] : memref<96x128xf32, #tpu.memory_space<vmem>>, vector<64x4xf32>
    %c0_19 = arith.constant 0 : index
    %c14 = arith.constant 14 : index
    %92 = vector.load %arg2[%c0_19, %c14] : memref<96x128xf32, #tpu.memory_space<vmem>>, vector<64x1xf32>
    %c80 = arith.constant 80 : index
    %c0_20 = arith.constant 0 : index
    %93 = vector.load %arg2[%c80, %c0_20] : memref<96x128xf32, #tpu.memory_space<vmem>>, vector<8x64xf32>
    %c80_21 = arith.constant 80 : index
    %c64_22 = arith.constant 64 : index
    %94 = vector.load %arg2[%c80_21, %c64_22] : memref<96x128xf32, #tpu.memory_space<vmem>>, vector<8x1xf32>
    %95 = vector.shape_cast %92 : vector<64x1xf32> to vector<64x1xf32>
    %96 = vector.broadcast %95 : vector<64x1xf32> to vector<64x16xf32>
    %97 = vector.extract_strided_slice %91 {offsets = [0, 0], sizes = [64, 1], strides = [1, 1]} : vector<64x4xf32> to vector<64x1xf32>
    %98 = vector.extract_strided_slice %89 {offsets = [0, 0], sizes = [1, 16], strides = [1, 1]} : vector<4x16xf32> to vector<1x16xf32>
    %99 = vector.broadcast %97 : vector<64x1xf32> to vector<64x16xf32>
    %100 = vector.broadcast %98 : vector<1x16xf32> to vector<64x16xf32>
    %101 = arith.mulf %99, %100 : vector<64x16xf32>
    %102 = arith.addf %96, %101 : vector<64x16xf32>
    %103 = vector.extract_strided_slice %91 {offsets = [0, 1], sizes = [64, 1], strides = [1, 1]} : vector<64x4xf32> to vector<64x1xf32>
    %104 = vector.extract_strided_slice %89 {offsets = [1, 0], sizes = [1, 16], strides = [1, 1]} : vector<4x16xf32> to vector<1x16xf32>
    %105 = vector.broadcast %103 : vector<64x1xf32> to vector<64x16xf32>
    %106 = vector.broadcast %104 : vector<1x16xf32> to vector<64x16xf32>
    %107 = arith.mulf %105, %106 : vector<64x16xf32>
    %108 = arith.addf %102, %107 : vector<64x16xf32>
    %109 = vector.extract_strided_slice %91 {offsets = [0, 2], sizes = [64, 1], strides = [1, 1]} : vector<64x4xf32> to vector<64x1xf32>
    %110 = vector.extract_strided_slice %89 {offsets = [2, 0], sizes = [1, 16], strides = [1, 1]} : vector<4x16xf32> to vector<1x16xf32>
    %111 = vector.broadcast %109 : vector<64x1xf32> to vector<64x16xf32>
    %112 = vector.broadcast %110 : vector<1x16xf32> to vector<64x16xf32>
    %113 = arith.mulf %111, %112 : vector<64x16xf32>
    %114 = arith.addf %108, %113 : vector<64x16xf32>
    %115 = vector.extract_strided_slice %91 {offsets = [0, 3], sizes = [64, 1], strides = [1, 1]} : vector<64x4xf32> to vector<64x1xf32>
    %116 = vector.extract_strided_slice %89 {offsets = [3, 0], sizes = [1, 16], strides = [1, 1]} : vector<4x16xf32> to vector<1x16xf32>
    %117 = vector.broadcast %115 : vector<64x1xf32> to vector<64x16xf32>
    %118 = vector.broadcast %116 : vector<1x16xf32> to vector<64x16xf32>
    %119 = arith.mulf %117, %118 : vector<64x16xf32>
    %120 = arith.addf %114, %119 : vector<64x16xf32>
    %121 = arith.negf %120 : vector<64x16xf32>
    %122 = math.exp %121 : vector<64x16xf32>
    %cst_23 = arith.constant 1.000000e+00 : f32
    %123 = vector.broadcast %cst_23 : f32 to vector<64x16xf32>
    %124 = arith.addf %123, %122 : vector<64x16xf32>
    %125 = arith.divf %123, %124 : vector<64x16xf32>
    %cst_24 = arith.constant dense<0.000000e+00> : vector<8x16xf32>
    %126 = tpu.matmul %93, %125, %cst_24 {dimension_numbers = #tpu.dot_dimension_numbers<[1], [0], [0], [1], [0, 0, 1, 1], [], []>} : vector<8x64xf32>, vector<64x16xf32>, vector<8x16xf32> -> vector<8x16xf32>
    %127 = vector.broadcast %94 : vector<8x1xf32> to vector<8x16xf32>
    %128 = arith.addf %126, %127 : vector<8x16xf32>
    %129 = vector.extract_strided_slice %128 {offsets = [0, 0], sizes = [4, 16], strides = [1, 1]} : vector<8x16xf32> to vector<4x16xf32>
    %130 = vector.extract_strided_slice %128 {offsets = [4, 0], sizes = [4, 16], strides = [1, 1]} : vector<8x16xf32> to vector<4x16xf32>
    %131 = math.exp %129 : vector<4x16xf32>
    %132 = arith.mulf %45, %131 : vector<4x16xf32>
    %133 = arith.addf %132, %130 : vector<4x16xf32>
    %134 = arith.addf %90, %129 : vector<4x16xf32>
    %c0_25 = arith.constant 0 : index
    %c15 = arith.constant 15 : index
    %135 = vector.load %arg2[%c0_25, %c15] : memref<96x128xf32, #tpu.memory_space<vmem>>, vector<64x4xf32>
    %c0_26 = arith.constant 0 : index
    %c19 = arith.constant 19 : index
    %136 = vector.load %arg2[%c0_26, %c19] : memref<96x128xf32, #tpu.memory_space<vmem>>, vector<64x1xf32>
    %c88 = arith.constant 88 : index
    %c0_27 = arith.constant 0 : index
    %137 = vector.load %arg2[%c88, %c0_27] : memref<96x128xf32, #tpu.memory_space<vmem>>, vector<8x64xf32>
    %c88_28 = arith.constant 88 : index
    %c64_29 = arith.constant 64 : index
    %138 = vector.load %arg2[%c88_28, %c64_29] : memref<96x128xf32, #tpu.memory_space<vmem>>, vector<8x1xf32>
    %139 = vector.shape_cast %136 : vector<64x1xf32> to vector<64x1xf32>
    %140 = vector.broadcast %139 : vector<64x1xf32> to vector<64x16xf32>
    %141 = vector.extract_strided_slice %135 {offsets = [0, 0], sizes = [64, 1], strides = [1, 1]} : vector<64x4xf32> to vector<64x1xf32>
    %142 = vector.extract_strided_slice %133 {offsets = [0, 0], sizes = [1, 16], strides = [1, 1]} : vector<4x16xf32> to vector<1x16xf32>
    %143 = vector.broadcast %141 : vector<64x1xf32> to vector<64x16xf32>
    %144 = vector.broadcast %142 : vector<1x16xf32> to vector<64x16xf32>
    %145 = arith.mulf %143, %144 : vector<64x16xf32>
    %146 = arith.addf %140, %145 : vector<64x16xf32>
    %147 = vector.extract_strided_slice %135 {offsets = [0, 1], sizes = [64, 1], strides = [1, 1]} : vector<64x4xf32> to vector<64x1xf32>
    %148 = vector.extract_strided_slice %133 {offsets = [1, 0], sizes = [1, 16], strides = [1, 1]} : vector<4x16xf32> to vector<1x16xf32>
    %149 = vector.broadcast %147 : vector<64x1xf32> to vector<64x16xf32>
    %150 = vector.broadcast %148 : vector<1x16xf32> to vector<64x16xf32>
    %151 = arith.mulf %149, %150 : vector<64x16xf32>
    %152 = arith.addf %146, %151 : vector<64x16xf32>
    %153 = vector.extract_strided_slice %135 {offsets = [0, 2], sizes = [64, 1], strides = [1, 1]} : vector<64x4xf32> to vector<64x1xf32>
    %154 = vector.extract_strided_slice %133 {offsets = [2, 0], sizes = [1, 16], strides = [1, 1]} : vector<4x16xf32> to vector<1x16xf32>
    %155 = vector.broadcast %153 : vector<64x1xf32> to vector<64x16xf32>
    %156 = vector.broadcast %154 : vector<1x16xf32> to vector<64x16xf32>
    %157 = arith.mulf %155, %156 : vector<64x16xf32>
    %158 = arith.addf %152, %157 : vector<64x16xf32>
    %159 = vector.extract_strided_slice %135 {offsets = [0, 3], sizes = [64, 1], strides = [1, 1]} : vector<64x4xf32> to vector<64x1xf32>
    %160 = vector.extract_strided_slice %133 {offsets = [3, 0], sizes = [1, 16], strides = [1, 1]} : vector<4x16xf32> to vector<1x16xf32>
    %161 = vector.broadcast %159 : vector<64x1xf32> to vector<64x16xf32>
    %162 = vector.broadcast %160 : vector<1x16xf32> to vector<64x16xf32>
    %163 = arith.mulf %161, %162 : vector<64x16xf32>
    %164 = arith.addf %158, %163 : vector<64x16xf32>
    %165 = arith.negf %164 : vector<64x16xf32>
    %166 = math.exp %165 : vector<64x16xf32>
    %cst_30 = arith.constant 1.000000e+00 : f32
    %167 = vector.broadcast %cst_30 : f32 to vector<64x16xf32>
    %168 = arith.addf %167, %166 : vector<64x16xf32>
    %169 = arith.divf %167, %168 : vector<64x16xf32>
    %cst_31 = arith.constant dense<0.000000e+00> : vector<8x16xf32>
    %170 = tpu.matmul %137, %169, %cst_31 {dimension_numbers = #tpu.dot_dimension_numbers<[1], [0], [0], [1], [0, 0, 1, 1], [], []>} : vector<8x64xf32>, vector<64x16xf32>, vector<8x16xf32> -> vector<8x16xf32>
    %171 = vector.broadcast %138 : vector<8x1xf32> to vector<8x16xf32>
    %172 = arith.addf %170, %171 : vector<8x16xf32>
    %173 = vector.extract_strided_slice %172 {offsets = [0, 0], sizes = [4, 16], strides = [1, 1]} : vector<8x16xf32> to vector<4x16xf32>
    %174 = vector.extract_strided_slice %172 {offsets = [4, 0], sizes = [4, 16], strides = [1, 1]} : vector<8x16xf32> to vector<4x16xf32>
    %175 = math.exp %173 : vector<4x16xf32>
    %176 = arith.mulf %89, %175 : vector<4x16xf32>
    %177 = arith.addf %176, %174 : vector<4x16xf32>
    %178 = arith.addf %134, %173 : vector<4x16xf32>
    %179 = arith.mulf %177, %177 : vector<4x16xf32>
    %180 = arith.mulf %133, %133 : vector<4x16xf32>
    %181 = arith.addf %179, %180 : vector<4x16xf32>
    %cst_32 = arith.constant dense<0.000000e+00> : vector<16xf32>
    %182 = vector.multi_reduction <add>, %181, %cst_32 [0] : vector<4x16xf32> to vector<16xf32>
    %183 = vector.shape_cast %182 : vector<16xf32> to vector<1x16xf32>
    %cst_33 = arith.constant -5.000000e-01 : f32
    %184 = vector.broadcast %cst_33 : f32 to vector<1x16xf32>
    %185 = arith.mulf %184, %183 : vector<1x16xf32>
    %cst_34 = arith.constant 7.35150814 : f32
    %186 = vector.broadcast %cst_34 : f32 to vector<1x16xf32>
    %187 = arith.subf %185, %186 : vector<1x16xf32>
    %cst_35 = arith.constant dense<0.000000e+00> : vector<16xf32>
    %188 = vector.multi_reduction <add>, %178, %cst_35 [0] : vector<4x16xf32> to vector<16xf32>
    %189 = vector.shape_cast %188 : vector<16xf32> to vector<1x16xf32>
    %190 = tpu.concatenate %177, %133, %187, %189 in 0 : vector<4x16xf32>, vector<4x16xf32>, vector<1x16xf32>, vector<1x16xf32> -> vector<10x16xf32>
    %c0_36 = arith.constant 0 : index
    %c0_37 = arith.constant 0 : index
    %191 = vector.load %arg3[%c0_36, %c0_37] : memref<10x16xf32, #tpu.memory_space<vmem>>, vector<10x16xf32>
    tpu.vector_store %arg3[%c0_36, %c0_37], %190 {strides = array<i32>} : memref<10x16xf32, #tpu.memory_space<vmem>>, vector<10x16xf32>,
    return
  }
  func.func @transform_0(%arg0: i32) -> (i32, i32) {
    %c0_i32 = arith.constant 0 : i32
    %c0_i32_0 = arith.constant 0 : i32
    return %c0_i32, %arg0 : i32, i32
  }
  func.func @transform_1(%arg0: i32) -> (i32, i32) {
    %c0_i32 = arith.constant 0 : i32
    %c0_i32_0 = arith.constant 0 : i32
    %c0_i32_1 = arith.constant 0 : i32
    return %c0_i32, %c0_i32_0 : i32, i32
  }
  func.func @transform_2(%arg0: i32) -> (i32, i32) {
    %c0_i32 = arith.constant 0 : i32
    %c0_i32_0 = arith.constant 0 : i32
    return %c0_i32, %arg0 : i32, i32
  }
}

</mosaic_0001>

<bundles_post_ra>
// kernel: realnvp_forward.1
= control target key start
LH: loop header
LB: loop body
LE: loop exit
PB: predicated region body
PF: predicated region fallthrough
CT: control target
= control target key end

     0   :  { %7 = vsyncpa [#allocation3], 0  ;;  %s3324_s0 = inlined_call_operand.hbm [shape: f32[8,16], index: 0, kind: input, shape index: {}]   ;;  %s3325_s1 = inlined_call_operand.hbm [shape: f32[96,128], index: 1, kind: input, shape index: {}]   ;;  %s3326_s2 = inlined_call_operand.vmem [shape: f32[10,16], index: 2, kind: output, shape index: {}]  }
   0x1   :  { %s14_s11 = sshll.u32 %s3324_s0, 4  ;;  %s15_s11 = int_to_ptr.hbm [resolvable:$true] %s14_s11 }
   0x2   :  { %8 = vsyncpa [#allocation5], 0  ;;  %s2121_s12 = smov [#allocation2]   ;;  %s24_s16 = sshll.u32 %s3325_s1, 4  ;;  %s25_s16 = int_to_ptr.hbm [resolvable:$true] %s24_s16 }
   0x3   :  { %s16_s13 = sshll.u32 %s2121_s12, 4  ;;  %s2122_s17 = smov [#allocation4]   ;;  %s17_s13 = int_to_ptr.vmem [resolvable:$true] %s16_s13 }
   0x4   :  { %19 = dma.hbm_to_vmem [thread:$0]  %s15_s11, 128, %s17_s13, [#allocation3]  }
   0x5   :  { %s26_s18 = sshll.u32 %s2122_s17, 4  ;;  %s2123_s19 = smov 128   ;;  %s27_s18 = int_to_ptr.vmem [resolvable:$true] %s26_s18 }
   0x6   :  { %s2124_s20 = smov 8  }
   0x7   :  { %32 = dma.hbm_to_vmem [thread:$0]  %s25_s16, 1536, %s27_s18, [#allocation5], %s2123_s19, %s2123_s19, %s2124_s20  }
   0x8   :  { %2117 = dma.done.wait [#allocation3], 128  }
   0x9   :  { %2118 = vsyncadd [#allocation3], 4294967168 }
   0xa   :  { %2119 = dma.done.wait [#allocation5], 1536  }
   0xb   :  { %2120 = vsyncadd [#allocation5], 4294965760  ;;  %v2125_v0 = vmov 4   ;;  %v2167_v1 = vld [vmem:[#allocation4 + $0x20] sm:$0xff]  ;;  %v2169_v2 = vld [vmem:[#allocation4 + $0x10] sm:$0xff]  ;;  %v2126_v9 = vmov 0  }
   0xc   :  { %1825 = vset.pattern.permute.xlu2 %v2125_v0  ;;  %1824 = vset.pattern.permute.xlu1 %v2125_v0  ;;  %v2171_v3 = vld [vmem:[#allocation4] sm:$0xff]  ;;  %v2176_v4 = vld [vmem:[#allocation4 + $0x28] sm:$0xff]  ;;  %v2178_v5 = vld [vmem:[#allocation4 + $0x18] sm:$0xff]  ;;  %v2127_v10 = vmov 1   ;;  %v2128_v11 = vmov 2   ;;  %v2129_v12 = vmov 3  }
   0xd   :  { %1823 = vset.pattern.permute.xlu0 %v2125_v0  ;;  %74 = vperm.xlu2 %1825, %v2167_v1   ;;  %v2180_v6 = vld [vmem:[#allocation4 + $0x8] sm:$0xff]  ;;  %v2185_v7 = vld [vmem:[#allocation4 + $0x38] sm:$0xff]  ;;  %v2187_v8 = vld [vmem:[#allocation4 + $0x30] sm:$0xff]  ;;  %v2130_v22 = vmov 9   ;;  %v2131_v36 = vmov 5   ;;  %v3327_v40 = vmov 64  }
   0xe   :  { %64 = vperm.xlu1 %1824, %v2169_v2   ;;  %54 = vperm.xlu0 %1823, %v2171_v3   ;;  %v41_v26 = vld [vmem:[#allocation2] sm:$0xf]  ;;  %v2261_v41 = vld [vmem:[#allocation4 + $0x40] sm:$0xff] }
   0xf   :  { %v2245_v27 = vperm.slane %v41_v26, 0  ;;  %v2271_v46 = vperm.slane %v41_v26, 1  ;;  %v2276_v51 = vperm.slane %v41_v26, 2  ;;  %v2284_v57 = vperm.slane %v41_v26, 3 }
  0x15   :  { %79 = vperm.xlu2 %1825, %v2176_v4  }
  0x16   :  { %69 = vperm.xlu1 %1824, %v2178_v5   ;;  %59 = vperm.xlu0 %1823, %v2180_v6  }
  0x1d   :  { %1826 = vset.pattern.permute.xlu2 %v2126_v9 }
  0x1e   :  { %89 = vperm.xlu1 %1824, %v2185_v7   ;;  %84 = vperm.xlu0 %1823, %v2187_v8  }
  0x1f   :  { %93 = vperm.xlu2 %1826, %v2171_v3  }
  0x26   :  { %1828 = vset.pattern.permute.xlu1 %v2126_v9  ;;  %1827 = vset.pattern.permute.xlu0 %v2126_v9 }
  0x27   :  { %101 = vperm.xlu1 %1828, %v2169_v2   ;;  %105 = vperm.xlu2 %1826, %v2178_v5  }
  0x28   :  { %97 = vperm.xlu0 %1827, %v2180_v6  }
  0x2f   :  { %109 = vperm.xlu1 %1828, %v2167_v1   ;;  %113 = vperm.xlu2 %1826, %v2176_v4  }
  0x30   :  { %117 = vperm.xlu0 %1827, %v2187_v8  }
  0x37   :  { %121 = vperm.xlu1 %1828, %v2185_v7   ;;  %1829 = vset.pattern.permute.xlu2 %v2127_v10 }
  0x38   :  { %1830 = vset.pattern.permute.xlu0 %v2127_v10  ;;  %142 = vperm.xlu2 %1829, %v2171_v3  }
  0x39   :  { %146 = vperm.xlu0 %1830, %v2180_v6  }
  0x3f   :  { %1831 = vset.pattern.permute.xlu1 %v2127_v10 }
  0x40   :  { %150 = vperm.xlu1 %1831, %v2169_v2   ;;  %154 = vperm.xlu2 %1829, %v2178_v5  }
  0x41   :  { %170 = vperm.xlu0 %1830, %v2185_v7  }
  0x48   :  { %158 = vperm.xlu1 %1831, %v2167_v1   ;;  %162 = vperm.xlu2 %1829, %v2176_v4  }
  0x49   :  { %1833 = vset.pattern.permute.xlu0 %v2128_v11 }
  0x4a   :  { %215 = vperm.xlu0 %1833, %v2187_v8  }
  0x50   :  { %166 = vperm.xlu1 %1831, %v2187_v8   ;;  %1832 = vset.pattern.permute.xlu2 %v2128_v11 }
  0x51   :  { %219 = vperm.xlu2 %1832, %v2185_v7  }
  0x52   :  { %1835 = vset.pattern.permute.xlu0 %v2129_v12 }
  0x53   :  { %260 = vperm.xlu0 %1835, %v2176_v4  }
  0x58   :  { %1834 = vset.pattern.permute.xlu1 %v2129_v12 }
  0x59   :  { %268 = vperm.xlu1 %1834, %v2185_v7   ;;  %211 = vperm.xlu2 %1832, %v2176_v4  }
  0x5b   :  { %1838 = vset.pattern.permute.xlu0 %v2128_v11 }
  0x5c   :  { %195 = vperm.xlu0 %1838, %v2180_v6  }
  0x61   :  { %264 = vperm.xlu1 %1834, %v2187_v8   ;;  %207 = vperm.xlu2 %1832, %v2167_v1  }
  0x64   :  { %1842 = vset.pattern.permute.xlu0 %v3327_v40 }
  0x65   :  { %442 = vperm.xlu0 %1842, %v2261_v41  }
  0x67   :  { %v2215_v13 = vpop.permute.xlu2 %74 }
  0x69   :  { %1836 = vset.pattern.permute.xlu1 %v2128_v11  ;;  %1837 = vset.pattern.permute.xlu2 %v2129_v12 }
  0x6a   :  { %203 = vperm.xlu1 %1836, %v2178_v5   ;;  %256 = vperm.xlu2 %1837, %v2167_v1  }
  0x6d   :  { %1845 = vset.pattern.permute.xlu0 %v2130_v22 }
  0x6e   :  { %494 = vperm.xlu0 %1845, %v2167_v1  }
  0x6f   :  { %v2219_v14 = vpop.permute.xlu2 %79 }
  0x72   :  { %199 = vperm.xlu1 %1836, %v2169_v2   ;;  %252 = vperm.xlu2 %1837, %v2178_v5  }
  0x76   :  { %1847 = vset.pattern.permute.xlu0 %v2131_v36 }
  0x77   :  { %514 = vperm.xlu0 %1847, %v2180_v6  }
  0x79   :  { %v2223_v15 = vpop.permute.xlu2 %93 }
  0x7a   :  { %1839 = vset.pattern.permute.xlu1 %v2129_v12  ;;  %1840 = vset.pattern.permute.xlu2 %v2128_v11  ;;  %v2133_v11 = vmov 7  }
  0x7b   :  { %248 = vperm.xlu1 %1839, %v2169_v2   ;;  %191 = vperm.xlu2 %1840, %v2171_v3  }
  0x7f   :  { %538 = vperm.xlu0 %1847, %v2185_v7  }
  0x80   :  { %v2227_v16 = vpop.permute.xlu1 %64  ;;  %v2229_v17 = vpop.permute.xlu0 %54 }
  0x81   :  { %v2231_v18 = vpop.permute.xlu2 %105 }
  0x83   :  { %244 = vperm.xlu1 %1839, %v2180_v6   ;;  %1841 = vset.pattern.permute.xlu2 %v2129_v12 }
  0x84   :  { %240 = vperm.xlu2 %1841, %v2171_v3  }
  0x88   :  { %v2235_v19 = vpop.permute.xlu1 %69  ;;  %v60_v20 = vpop.permute.xlu0 %59 }
  0x89   :  { %v114_v21 = vpop.permute.xlu2 %113 }
  0x8a   :  { %v130_v50 = vmul.f32 %v2245_v27, %v114_v21 }
  0x8b   :  { %1843 = vset.pattern.permute.xlu1 %v2130_v22 }
  0x8c   :  { %478 = vperm.xlu1 %1843, %v2171_v3   ;;  %1844 = vset.pattern.permute.xlu2 %v2130_v22  ;;  %v138_v55 = vadd.f32 %v130_v50, %v2219_v14 }
  0x8d   :  { %482 = vperm.xlu2 %1844, %v2180_v6  }
  0x90   :  { %v90_v23 = vpop.permute.xlu1 %89  ;;  %v2239_v24 = vpop.permute.xlu0 %84 }
  0x92   :  { %v2241_v25 = vpop.permute.xlu2 %142 }
  0x94   :  { %486 = vperm.xlu1 %1843, %v2169_v2  }
  0x95   :  { %490 = vperm.xlu2 %1844, %v2178_v5  }
  0x99   :  { %v2247_v28 = vpop.permute.xlu1 %101 }
  0x9a   :  { %v98_v29 = vpop.permute.xlu0 %97  ;;  %v2249_v30 = vpop.permute.xlu2 %154 }
  0x9b   :  { %v126_v31 = vmul.f32 %v2245_v27, %v98_v29 }
  0x9c   :  { %498 = vperm.xlu1 %1843, %v2176_v4  }
  0x9d   :  { %v2253_v32 = vadd.f32 %v126_v31, %v60_v20  ;;  %502 = vperm.xlu2 %1844, %v2187_v8  }
  0xa1   :  { %v110_v33 = vpop.permute.xlu1 %109 }
  0xa2   :  { %v118_v34 = vpop.permute.xlu0 %117  ;;  %v163_v35 = vpop.permute.xlu2 %162  ;;  %v129_v47 = vmul.f32 %v2245_v27, %v110_v33 }
  0xa3   :  { %v179_v54 = vmul.f32 %v2271_v46, %v163_v35  ;;  %v131_v29 = vmul.f32 %v2245_v27, %v118_v34 }
  0xa4   :  { %506 = vperm.xlu1 %1843, %v2185_v7   ;;  %v137_v53 = vadd.f32 %v129_v47, %v2215_v13 }
  0xa5   :  { %1846 = vset.pattern.permute.xlu2 %v2131_v36  ;;  %v187_v62 = vadd.f32 %v179_v54, %v138_v55 }
  0xa6   :  { %510 = vperm.xlu2 %1846, %v2171_v3  }
  0xa9   :  { %v122_v37 = vpop.permute.xlu1 %121 }
  0xaa   :  { %v132_v56 = vmul.f32 %v2245_v27, %v122_v37 }
  0xab   :  { %v2258_v38 = vpop.permute.xlu0 %146  ;;  %v220_v39 = vpop.permute.xlu2 %219 }
  0xac   :  { %1848 = vset.pattern.permute.xlu1 %v2131_v36  ;;  %v140_v0 = vadd.f32 %v132_v56, %v90_v23  ;;  %v230_v21 = vmul.f32 %v2276_v51, %v220_v39  ;;  %v2134_v39 = vmov 6  }
  0xad   :  { %518 = vperm.xlu1 %1848, %v2169_v2   ;;  %1850 = vset.pattern.permute.xlu0 %v2134_v39 }
  0xae   :  { %522 = vperm.xlu2 %1846, %v2178_v5   ;;  %583 = vperm.xlu0 %1850, %v2187_v8  }
  0xb2   :  { %v2266_v42 = vpop.permute.xlu1 %150 }
  0xb3   :  { %v171_v43 = vpop.permute.xlu0 %170  ;;  %v212_v44 = vpop.permute.xlu2 %211 }
  0xb4   :  { %v228_v58 = vmul.f32 %v2276_v51, %v212_v44  ;;  %v181_v63 = vmul.f32 %v2271_v46, %v171_v43 }
  0xb5   :  { %526 = vperm.xlu1 %1848, %v2167_v1  }
  0xb6   :  { %530 = vperm.xlu2 %1846, %v2176_v4   ;;  %v236_v12 = vadd.f32 %v228_v58, %v187_v62  ;;  %v189_v22 = vadd.f32 %v181_v63, %v140_v0  ;;  %v125_v62 = vmul.f32 %v2245_v27, %v2223_v15  ;;  %575 = vperm.xlu0 %1850, %v2167_v1  }
  0xb7   :  { %v177_v0 = vmul.f32 %v2271_v46, %v2249_v30  ;;  %v174_v15 = vmul.f32 %v2271_v46, %v2241_v25 }
  0xb8   :  { %v238_v36 = vadd.f32 %v230_v21, %v189_v22 }
  0xba   :  { %v159_v45 = vpop.permute.xlu1 %158 }
  0xbb   :  { %v208_v48 = vpop.permute.xlu2 %207  ;;  %v178_v52 = vmul.f32 %v2271_v46, %v159_v45  ;;  %v139_v45 = vadd.f32 %v131_v29, %v2239_v24 }
  0xbc   :  { %v216_v49 = vpop.permute.xlu0 %215  ;;  %v227_v60 = vmul.f32 %v2276_v51, %v208_v48 }
  0xbd   :  { %534 = vperm.xlu1 %1848, %v2187_v8   ;;  %v186_v59 = vadd.f32 %v178_v52, %v137_v53  ;;  %v229_v34 = vmul.f32 %v2276_v51, %v216_v49  ;;  %v128_v49 = vmul.f32 %v2245_v27, %v2231_v18 }
  0xbe   :  { %1849 = vset.pattern.permute.xlu2 %v2134_v39  ;;  %571 = vperm.xlu0 %1850, %v2178_v5  }
  0xbf   :  { %v235_v13 = vadd.f32 %v227_v60, %v186_v59  ;;  %587 = vperm.xlu2 %1849, %v2185_v7   ;;  %v136_v18 = vadd.f32 %v128_v49, %v2235_v19 }
  0xc2   :  { %v167_v61 = vpop.permute.xlu1 %166 }
  0xc3   :  { %v180_v37 = vmul.f32 %v2271_v46, %v167_v61 }
  0xc4   :  { %v257_v9 = vpop.permute.xlu2 %256 }
  0xc5   :  { %v261_v10 = vpop.permute.xlu0 %260  ;;  %1851 = vset.pattern.permute.xlu1 %v2133_v11  ;;  %v276_v14 = vmul.f32 %v2284_v57, %v257_v9  ;;  %v188_v48 = vadd.f32 %v180_v37, %v139_v45 }
  0xc6   :  { %v277_v20 = vmul.f32 %v2284_v57, %v261_v10  ;;  %636 = vperm.xlu1 %1851, %v2185_v7   ;;  %v133_v10 = vadd.f32 %v125_v62, %v2229_v17  ;;  %567 = vperm.xlu0 %1850, %v2169_v2  }
  0xc7   :  { %v284_v26 = vadd.f32 %v276_v14, %v235_v13  ;;  %v237_v24 = vadd.f32 %v229_v34, %v188_v48  ;;  %579 = vperm.xlu2 %1849, %v2176_v4   ;;  %v185_v13 = vadd.f32 %v177_v0, %v136_v18 }
  0xc8   :  { %v285_v23 = vadd.f32 %v277_v20, %v236_v12 }
  0xc9   :  { %v1765_v31 = vmul.f32 -1.442695, %v284_v26 }
  0xca   :  { %v1766_v33 = vmul.f32 -1.442695, %v285_v23  ;;  %v182_v23 = vadd.f32 %v174_v15, %v133_v10 }
  0xcb   :  { %v269_v35 = vpop.permute.xlu1 %268  ;;  %1919 = vpow2.f32 %v1765_v31 }
  0xcc   :  { %v279_v43 = vmul.f32 %v2284_v57, %v269_v35  ;;  %1921 = vpow2.f32 %v1766_v33  ;;  %v253_v44 = vpop.permute.xlu2 %252 }
  0xcd   :  { %v275_v14 = vmul.f32 %v2284_v57, %v253_v44  ;;  %v127_v44 = vmul.f32 %v2245_v27, %v2247_v28 }
  0xce   :  { %v287_v47 = vadd.f32 %v279_v43, %v238_v36  ;;  %632 = vperm.xlu1 %1851, %v2187_v8   ;;  %v196_v27 = vpop.permute.xlu0 %195  ;;  %563 = vperm.xlu0 %1850, %v2180_v6  }
  0xcf   :  { %v224_v10 = vmul.f32 %v2276_v51, %v196_v27 }
  0xd0   :  { %v1768_v50 = vmul.f32 -1.442695, %v287_v47 }
  0xd1   :  { %v1920_v52 = vpop.eup %1919 }
  0xd2   :  { %1923 = vpow2.f32 %v1768_v50  ;;  %v1922_v53 = vpop.eup %1921  ;;  %v2306_v58 = vadd.f32 1.0, %v1920_v52 }
  0xd3   :  { %v265_v54 = vpop.permute.xlu1 %264  ;;  %v2303_v55 = vadd.f32 1.0, %v1922_v53 }
  0xd4   :  { %v278_v56 = vmul.f32 %v2284_v57, %v265_v54  ;;  %v176_v54 = vmul.f32 %v2271_v46, %v2266_v42  ;;  %vm385_vm11 = vweird.f32 %v2306_v58 }
  0xd5   :  { %v192_v60 = vpop.permute.xlu2 %191  ;;  %1925 = vrcp.f32 %v2303_v55  ;;  %vm400_vm6 = vweird.f32 %v2303_v55 }
  0xd6   :  { %v286_v59 = vadd.f32 %v278_v56, %v237_v24  ;;  %628 = vperm.xlu1 %1851, %v2176_v4   ;;  %1927 = vrcp.f32 %v2306_v58  ;;  %v223_v19 = vmul.f32 %v2276_v51, %v192_v60  ;;  %v135_v24 = vadd.f32 %v127_v44, %v2227_v16  ;;  %559 = vperm.xlu0 %1850, %v2171_v3  }
  0xd7   :  { %v175_v16 = vmul.f32 %v2271_v46, %v2258_v38 }
  0xd8   :  { %v1924_v61 = vpop.eup %1923  ;;  %v1767_v63 = vmul.f32 -1.442695, %v286_v59  ;;  %v231_v37 = vadd.f32 %v223_v19, %v182_v23  ;;  %v2135_v59 = vmov 8   ;;  %v184_v18 = vadd.f32 %v176_v54, %v135_v24 }
  0xd9   :  { %v319_v9 = vadd.f32 1.0, %v1924_v61  ;;  %1852 = vset.pattern.permute.xlu2 %v2135_v59  ;;  %v406_v23 = vand.u32 2147483648, %v2303_v55 }
  0xda   :  { %1929 = vpow2.f32 %v1767_v63  ;;  %685 = vperm.xlu2 %1852, %v2185_v7  }
  0xdb   :  { %1931 = vrcp.f32 %v319_v9  ;;  %v2325_v21 = vpop.eup %1925  ;;  %v436_v48 = vand.u32 2147483648, %v319_v9  ;;  %v434_v53 = vand.u32 2147483647, %v319_v9  ;;  %vm430_vm1 = vweird.f32 %v319_v9 }
  0xdc   :  { %v204_v12 = vpop.permute.xlu1 %203  ;;  %v2328_v30 = vpop.eup %1927  ;;  %v396_v35 = vmul.f32 %v2325_v21, %v2303_v55  ;;  %vm401_vm4 = vweird.f32 %v2325_v21 }
  0xdd   :  { %v226_v20 = vmul.f32 %v2276_v51, %v204_v12  ;;  %v381_v39 = vmul.f32 %v2328_v30, %v2306_v58  ;;  %v437_v62 = vor.u32 1.1754944e-38, %v436_v48  ;;  %vm435_vm3 = vcmp.eq.f32.partialorder %v434_v53, 8.507059e+37  ;;  %vm2373_vm9 = vmor %vm400_vm6, %vm401_vm4 }
  0xde   :  { %624 = vperm.xlu1 %1851, %v2167_v1   ;;  %v241_v26 = vpop.permute.xlu2 %240  ;;  %v397_v50 = vsub.f32 1.0, %v396_v35  ;;  %vm386_vm7 = vweird.f32 %v2328_v30  ;;  %1853 = vset.pattern.permute.xlu0 %v2133_v11 }
  0xdf   :  { %v234_v22 = vadd.f32 %v226_v20, %v185_v13  ;;  %v272_v33 = vmul.f32 %v2284_v57, %v241_v26  ;;  %v382_v56 = vsub.f32 1.0, %v381_v39  ;;  %v407_v39 = vor.u32 1.1754944e-38, %v406_v23  ;;  %vm2388_vm13 = vmor %vm385_vm11, %vm386_vm7  ;;  %608 = vperm.xlu0 %1853, %v2171_v3  }
  0xe0   :  { %v1930_v17 = vpop.eup %1929  ;;  %v398_v42 = vmul.f32 %v2325_v21, %v397_v50 }
  0xe1   :  { %v1932_v25 = vpop.eup %1931  ;;  %v2332_v29 = vadd.f32 1.0, %v1930_v17  ;;  %v283_v31 = vadd.f32 %v275_v14, %v234_v22  ;;  %v280_v34 = vadd.f32 %v272_v33, %v231_v37  ;;  %v383_v20 = vmul.f32 %v2328_v30, %v382_v56 }
  0xe2   :  { %v426_v36 = vmul.f32 %v1932_v25, %v319_v9  ;;  %vm431_vm0 = vweird.f32 %v1932_v25  ;;  %v399_v22 = vadd.f32 %v2325_v21, %v398_v42  ;;  %v404_v17 = vand.u32 2147483647, %v2303_v55  ;;  %681 = vperm.xlu2 %1852, %v2187_v8  }
  0xe3   :  { %1933 = vrcp.f32 %v2332_v29  ;;  %v1764_v43 = vmul.f32 -1.442695, %v283_v31  ;;  %v1761_v49 = vmul.f32 -1.442695, %v280_v34  ;;  %vm432_vm2 = vmor %vm430_vm1, %vm431_vm0  ;;  %v419_v14 = vand.u32 2147483647, %v2332_v29 }
  0xe4   :  { %v200_v45 = vpop.permute.xlu1 %199  ;;  %v427_v47 = vsub.f32 1.0, %v426_v36  ;;  %v421_v19 = vand.u32 2147483648, %v2332_v29  ;;  %vm415_vm8 = vweird.f32 %v2332_v29  ;;  %v384_v35 = vadd.f32 %v2328_v30, %v383_v20 }
  0xe5   :  { %1935 = vpow2.f32 %v1764_v43  ;;  %v225_v61 = vmul.f32 %v2276_v51, %v200_v45  ;;  %v389_v55 = vand.u32 2147483647, %v2306_v58  ;;  %v391_v37 = vand.u32 2147483648, %v2306_v58 }
  0xe6   :  { %v428_v52 = vmul.f32 %v1932_v25, %v427_v47  ;;  %620 = vperm.xlu1 %1851, %v2178_v5   ;;  %1937 = vpow2.f32 %v1761_v49  ;;  %v422_v36 = vor.u32 1.1754944e-38, %v421_v19  ;;  %vm420_vm12 = vcmp.eq.f32.partialorder %v419_v14, 8.507059e+37 }
  0xe7   :  { %v233_v38 = vadd.f32 %v225_v61, %v184_v18  ;;  %v403_v44 = vsel %vm2373_vm9, %v2325_v21, %v399_v22  ;;  %v183_v58 = vadd.f32 %v175_v16, %v2253_v32  ;;  %vm405_vm14 = vcmp.eq.f32.partialorder %v404_v17, 8.507059e+37 }
  0xe8   :  { %v429_v28 = vadd.f32 %v1932_v25, %v428_v52  ;;  %v388_v50 = vsel %vm2388_vm13, %v2328_v30, %v384_v35  ;;  %v408_v52 = vsel %vm405_vm14, %v407_v39, %v403_v44  ;;  %v392_v53 = vor.u32 1.1754944e-38, %v391_v37 }
  0xe9   :  { %v1934_v60 = vpop.eup %1933  ;;  %v232_v24 = vadd.f32 %v224_v10, %v183_v58  ;;  %vm390_vm15 = vcmp.eq.f32.partialorder %v389_v55, 8.507059e+37 }
  0xea   :  { %v433_v63 = vsel %vm432_vm2, %v1932_v25, %v429_v28  ;;  %v411_v0 = vmul.f32 %v1934_v60, %v2332_v29  ;;  %vm416_vm5 = vweird.f32 %v1934_v60  ;;  %v393_v28 = vsel %vm390_vm15, %v392_v53, %v388_v50  ;;  %677 = vperm.xlu2 %1852, %v2176_v4   ;;  %v2424_v50 = vpop.permute.xlu2 %482 }
  0xeb   :  { %v1936_v9 = vpop.eup %1935  ;;  %v438_v15 = vsel %vm435_vm3, %v437_v62, %v433_v63  ;;  %vm417_vm10 = vmor %vm415_vm8, %vm416_vm5 }
  0xec   :  { %v2357_v12 = vadd.f32 1.0, %v1936_v9  ;;  %456 = vmatpush.msra.mxu0 %v438_v15  ;;  %v412_v13 = vsub.f32 1.0, %v411_v0  ;;  %v1938_v45 = vpop.eup %1937 }
  0xed   :  { %v249_v46 = vpop.permute.xlu1 %248  ;;  %v2399_v32 = vadd.f32 1.0, %v1938_v45 }
  0xee   :  { %1939 = vrcp.f32 %v2357_v12  ;;  %v274_v51 = vmul.f32 %v2284_v57, %v249_v46  ;;  %v413_v26 = vmul.f32 %v1934_v60, %v412_v13  ;;  %616 = vperm.xlu1 %1851, %v2169_v2   ;;  %v376_v30 = vand.u32 2147483648, %v2357_v12 }
  0xef   :  { %v374_v61 = vand.u32 2147483647, %v2357_v12  ;;  %vm370_vm1 = vweird.f32 %v2357_v12  ;;  %v331_v37 = vand.u32 2147483648, %v2399_v32 }
  0xf0   :  { %v282_v25 = vadd.f32 %v274_v51, %v233_v38  ;;  %v414_v31 = vadd.f32 %v1934_v60, %v413_v26  ;;  %v377_v63 = vor.u32 1.1754944e-38, %v376_v30 }
  0xf1   :  { %vm375_vm3 = vcmp.eq.f32.partialorder %v374_v61, 8.507059e+37  ;;  %v332_v34 = vor.u32 1.1754944e-38, %v331_v37 }
  0xf2   :  { %v1763_v29 = vmul.f32 -1.442695, %v282_v25  ;;  %v418_v43 = vsel %vm417_vm10, %v1934_v60, %v414_v31  ;;  %673 = vperm.xlu2 %1852, %v2167_v1   ;;  %vm325_vm10 = vweird.f32 %v2399_v32 }
  0xf3   :  { %v423_v47 = vsel %vm420_vm12, %v422_v36, %v418_v43  ;;  %v329_v43 = vand.u32 2147483647, %v2399_v32 }
  0xf4   :  { %v1940_v48 = vpop.eup %1939  ;;  %1941 = vpow2.f32 %v1763_v29  ;;  %457 = vmatpush.msra.mxu0 %v423_v47 }
  0xf5   :  { %v245_v21 = vpop.permute.xlu1 %244  ;;  %v366_v54 = vmul.f32 %v1940_v48, %v2357_v12  ;;  %vm371_vm0 = vweird.f32 %v1940_v48  ;;  %1943 = vrcp.f32 %v2399_v32  ;;  %vm330_vm15 = vcmp.eq.f32.partialorder %v329_v43, 8.507059e+37 }
  0xf6   :  { %v273_v27 = vmul.f32 %v2284_v57, %v245_v21  ;;  %458 = vmatpush.msra.mxu0 %v408_v52  ;;  %612 = vperm.xlu1 %1851, %v2180_v6   ;;  %vm372_vm2 = vmor %vm370_vm1, %vm371_vm0  ;;  %vm445_vm0 = vcmask 523264   ;;  %v2428_v52 = vpop.permute.xlu2 %490 }
  0xf7   :  { %v367_v56 = vsub.f32 1.0, %v366_v54 }
  0xf8   :  { %v281_v60 = vadd.f32 %v273_v27, %v232_v24  ;;  %459 = vmatpush.msra.mxu0 %v393_v28  ;;  %v443_v28 = vpop.permute.xlu0 %442 }
  0xf9   :  { %v368_v49 = vmul.f32 %v1940_v48, %v367_v56  ;;  %v2136_v56 = vmov 14  }
  0xfa   :  { %v1942_v57 = vpop.eup %1941  ;;  %v1762_v62 = vmul.f32 -1.442695, %v281_v60  ;;  %669 = vperm.xlu2 %1852, %v2178_v5   ;;  %1857 = vset.pattern.permute.xlu0 %v2136_v56 }
  0xfb   :  { %v314_v42 = vadd.f32 1.0, %v1942_v57  ;;  %v369_v16 = vadd.f32 %v1940_v48, %v368_v49  ;;  %v1944_v18 = vpop.eup %1943  ;;  %898 = vperm.xlu0 %1857, %v2180_v6   ;;  %v2137_v57 = vmov 10  }
  0xfc   :  { %1945 = vpow2.f32 %v1762_v62  ;;  %v321_v14 = vmul.f32 %v1944_v18, %v2399_v32  ;;  %vm326_vm8 = vweird.f32 %v1944_v18  ;;  %v2438_v32 = vld [vmem:[#allocation4 + $0x48] sm:$0xff] }
  0xfd   :  { %1947 = vrcp.f32 %v314_v42  ;;  %v373_v0 = vsel %vm372_vm2, %v1940_v48, %v369_v16  ;;  %v361_v38 = vand.u32 2147483648, %v314_v42  ;;  %v359_v46 = vand.u32 2147483647, %v314_v42  ;;  %vm327_vm12 = vmor %vm325_vm10, %vm326_vm8 }
  0xfe   :  { %v378_v9 = vsel %vm375_vm3, %v377_v63, %v373_v0  ;;  %1854 = vset.pattern.permute.xlu1 %v2135_v59  ;;  %v322_v11 = vsub.f32 1.0, %v321_v14  ;;  %vm355_vm5 = vweird.f32 %v314_v42  ;;  %v2422_v58 = vpop.permute.xlu1 %478  ;;  %v2432_v54 = vpop.permute.xlu2 %502 }
  0xff   :  { %460 = vmatpush.msra.mxu0 %v378_v9  ;;  %661 = vperm.xlu1 %1854, %v2180_v6   ;;  %v362_v51 = vor.u32 1.1754944e-38, %v361_v38  ;;  %vm360_vm7 = vcmp.eq.f32.partialorder %v359_v46, 8.507059e+37  ;;  %v2138_v38 = vmov 11  }
 0x100   :  { %v323_v23 = vmul.f32 %v1944_v18, %v322_v11  ;;  %v2452_v49 = vpop.permute.xlu0 %494 }
 0x102   :  { %v1946_v10 = vpop.eup %1945  ;;  %v324_v55 = vadd.f32 %v1944_v18, %v323_v23  ;;  %665 = vperm.xlu2 %1852, %v2169_v2  }
 0x103   :  { %v1948_v15 = vpop.eup %1947  ;;  %v313_v12 = vadd.f32 1.0, %v1946_v10  ;;  %922 = vperm.xlu0 %1857, %v2185_v7  }
 0x104   :  { %v351_v13 = vmul.f32 %v1948_v15, %v314_v42  ;;  %vm356_vm4 = vweird.f32 %v1948_v15  ;;  %v328_v47 = vsel %vm327_vm12, %v1944_v18, %v324_v55  ;;  %v2140_v55 = vmov 13  }
 0x105   :  { %1949 = vrcp.f32 %v313_v12  ;;  %vm357_vm6 = vmor %vm355_vm5, %vm356_vm4  ;;  %v346_v33 = vand.u32 2147483648, %v313_v12  ;;  %v344_v36 = vand.u32 2147483647, %v313_v12  ;;  %vm340_vm11 = vweird.f32 %v313_v12 }
 0x106   :  { %v352_v20 = vsub.f32 1.0, %v351_v13  ;;  %v333_v48 = vsel %vm330_vm15, %v332_v34, %v328_v47  ;;  %v2426_v21 = vpop.permute.xlu1 %486  ;;  %v2436_v27 = vpop.permute.xlu2 %510 }
 0x107   :  { %1855 = vset.pattern.permute.xlu1 %v3327_v40  ;;  %v347_v44 = vor.u32 1.1754944e-38, %v346_v33  ;;  %vm345_vm14 = vcmp.eq.f32.partialorder %v344_v36, 8.507059e+37  ;;  %v42_v36 = vld [vmem:[#allocation2 + $0x4] sm:$0xf] }
 0x108   :  { %v353_v59 = vmul.f32 %v1948_v15, %v352_v20  ;;  %859 = vperm.xlu1 %1855, %v2438_v32   ;;  %v515_v6 = vpop.permute.xlu0 %514 }
 0x10a   :  { %v354_v19 = vadd.f32 %v1948_v15, %v353_v59  ;;  %657 = vperm.xlu2 %1852, %v2171_v3  }
 0x10b   :  { %v1950_v22 = vpop.eup %1949  ;;  %918 = vperm.xlu0 %1857, %v2187_v8  }
 0x10c   :  { %v358_v26 = vsel %vm357_vm6, %v1948_v15, %v354_v19  ;;  %v336_v17 = vmul.f32 %v1950_v22, %v313_v12  ;;  %vm341_vm9 = vweird.f32 %v1950_v22 }
 0x10d   :  { %v363_v25 = vsel %vm360_vm7, %v362_v51, %v358_v26  ;;  %vm342_vm13 = vmor %vm340_vm11, %vm341_vm9 }
 0x10e   :  { %461 = vmatpush.msra.mxu0 %v363_v25  ;;  %v337_v31 = vsub.f32 1.0, %v336_v17  ;;  %v2430_v53 = vpop.permute.xlu1 %498  ;;  %v2443_v60 = vpop.permute.xlu2 %522  ;;  %v2139_v25 = vmov 12  }
 0x110   :  { %v338_v35 = vmul.f32 %v1950_v22, %v337_v31  ;;  %1858 = vset.pattern.permute.xlu1 %v2136_v56  ;;  %v2469_v16 = vpop.permute.xlu0 %538 }
 0x111   :  { %902 = vperm.xlu1 %1858, %v2169_v2  }
 0x112   :  { %v339_v29 = vadd.f32 %v1950_v22, %v338_v35  ;;  %1856 = vset.pattern.permute.xlu2 %v2136_v56 }
 0x113   :  { %894 = vperm.xlu2 %1856, %v2171_v3   ;;  %1866 = vset.pattern.permute.xlu0 %v2140_v55 }
 0x114   :  { %v343_v45 = vsel %vm342_vm13, %v1950_v22, %v339_v29  ;;  %1101 = vperm.xlu0 %1866, %v2185_v7  }
 0x115   :  { %v348_v39 = vsel %vm345_vm14, %v347_v44, %v343_v45 }
 0x116   :  { %462 = vmatpush.msra.mxu0 %v348_v39  ;;  %v2434_v24 = vpop.permute.xlu1 %506  ;;  %v2454_v61 = vpop.permute.xlu2 %530 }
 0x118   :  { %463 = vmatpush.msra.mxu0 %v333_v48 }
 0x119   :  { %1769 = vmatmul.msk.f32.vlgmr.msra.gmra.mxu0 %vm445_vm0, %v2261_v41  ;;  %910 = vperm.xlu1 %1858, %v2167_v1  }
 0x11b   :  { %906 = vperm.xlu2 %1856, %v2178_v5  }
 0x11c   :  { %1871 = vset.pattern.permute.xlu0 %v2137_v57 }
 0x11d   :  { %934 = vperm.xlu0 %1871, %v2169_v2  }
 0x11e   :  { %v2464_v62 = vpop.permute.xlu2 %587 }
 0x11f   :  { %v2441_v41 = vpop.permute.xlu1 %518 }
 0x120   :  { %v2476_v9 = vpop.permute.xlu0 %583 }
 0x121   :  { %1860 = vset.pattern.permute.xlu1 %v2137_v57 }
 0x122   :  { %950 = vperm.xlu1 %1860, %v2187_v8  }
 0x123   :  { %1859 = vset.pattern.permute.xlu2 %v2137_v57 }
 0x124   :  { %954 = vperm.xlu2 %1859, %v2185_v7  }
 0x125   :  { %1876 = vset.pattern.permute.xlu0 %v2138_v38 }
 0x126   :  { %v2471_v63 = vpop.permute.xlu2 %579 }
 0x127   :  { %v2450_v30 = vpop.permute.xlu1 %526 }
 0x128   :  { %v2482_v15 = vpop.permute.xlu0 %575 }
 0x12a   :  { %946 = vperm.xlu1 %1860, %v2176_v4  }
 0x12c   :  { %1861 = vset.pattern.permute.xlu2 %v2138_v38 }
 0x12d   :  { %1003 = vperm.xlu2 %1861, %v2185_v7  }
 0x12f   :  { %v2462_v3 = vpop.permute.xlu1 %534 }
 0x130   :  { %v2488_v14 = vpop.permute.xlu0 %571 }
 0x132   :  { %1862 = vset.pattern.permute.xlu1 %v2136_v56 }
 0x133   :  { %914 = vperm.xlu1 %1862, %v2176_v4  }
 0x134   :  { %v2478_v18 = vpop.permute.xlu2 %685 }
 0x135   :  { %999 = vperm.xlu2 %1861, %v2187_v8  }
 0x138   :  { %v2467_v42 = vpop.permute.xlu1 %636  ;;  %v2498_v46 = vpop.permute.xlu0 %567 }
 0x13b   :  { %1864 = vset.pattern.permute.xlu1 %v2138_v38 }
 0x13c   :  { %v2484_v12 = vpop.permute.xlu2 %681  ;;  %995 = vperm.xlu1 %1864, %v2176_v4  }
 0x13d   :  { %1863 = vset.pattern.permute.xlu2 %v2137_v57 }
 0x13e   :  { %942 = vperm.xlu2 %1863, %v2167_v1  }
 0x140   :  { %v2474_v0 = vpop.permute.xlu1 %632  ;;  %v564_v22 = vpop.permute.xlu0 %563 }
 0x144   :  { %v2490_v20 = vpop.permute.xlu2 %677  ;;  %1867 = vset.pattern.permute.xlu1 %v2137_v57 }
 0x145   :  { %938 = vperm.xlu1 %1867, %v2178_v5  }
 0x146   :  { %1865 = vset.pattern.permute.xlu2 %v2139_v25 }
 0x147   :  { %1048 = vperm.xlu2 %1865, %v2187_v8  }
 0x148   :  { %v2480_v10 = vpop.permute.xlu1 %628  ;;  %v560_v33 = vpop.permute.xlu0 %559 }
 0x14c   :  { %v2500_v11 = vpop.permute.xlu2 %673 }
 0x14d   :  { %1869 = vset.pattern.permute.xlu1 %v2139_v25 }
 0x14e   :  { %1044 = vperm.xlu1 %1869, %v2176_v4  }
 0x14f   :  { %1868 = vset.pattern.permute.xlu2 %v2138_v38 }
 0x150   :  { %v2486_v13 = vpop.permute.xlu1 %624  ;;  %991 = vperm.xlu2 %1868, %v2167_v1  }
 0x151   :  { %v609_v34 = vpop.permute.xlu0 %608 }
 0x154   :  { %v2507_v51 = vpop.permute.xlu2 %669 }
 0x156   :  { %1872 = vset.pattern.permute.xlu1 %v2138_v38 }
 0x157   :  { %987 = vperm.xlu1 %1872, %v2178_v5  }
 0x158   :  { %v2496_v59 = vpop.permute.xlu1 %620  ;;  %1870 = vset.pattern.permute.xlu2 %v2140_v55 }
 0x15c   :  { %v2516_v35 = vpop.permute.xlu2 %665 }
 0x15f   :  { %1874 = vset.pattern.permute.xlu1 %v2140_v55 }
 0x160   :  { %v2505_v19 = vpop.permute.xlu1 %616 }
 0x164   :  { %v658_v56 = vpop.permute.xlu2 %657 }
 0x168   :  { %v613_v31 = vpop.permute.xlu1 %612 }
 0x171   :  { %v662_v39 = vpop.permute.xlu1 %661 }
 0x196   :  { %v465_v26 = vpop.f32.mrf.mxu0 }
 0x197   :  { %v2509_v17 = vadd.f32 %v465_v26, %v443_v28 }
 0x199   :  { %v468_v23 = vmul.f32 1.442695, %v2509_v17  ;;  %v472_v43 = vrot.slane %v2509_v17, 4 }
 0x19b   :  { %1951 = vpow2.f32 %v468_v23 }
 0x1a1   :  { %v1952_v37 = vpop.eup %1951 }
 0x1a2   :  { %v470_v29 = vmul.f32 %v1952_v37, %v42_v36 }
 0x1a4   :  { %v2523_v44 = vadd.f32 %v472_v43, %v470_v29 }
 0x1a6   :  { %v2527_v4 = vperm.slane %v2523_v44, 0  ;;  %v2530_v45 = vperm.slane %v2523_v44, 1  ;;  %v2533_v7 = vperm.slane %v2523_v44, 2  ;;  %v2536_v47 = vperm.slane %v2523_v44, 3 }
 0x1a8   :  { %v543_v8 = vmul.f32 %v2527_v4, %v515_v6  ;;  %v592_v48 = vmul.f32 %v2530_v45, %v564_v22  ;;  %v641_v28 = vmul.f32 %v2533_v7, %v613_v31  ;;  %v690_v26 = vmul.f32 %v2536_v47, %v662_v39 }
 0x1a9   :  { %v542_v23 = vmul.f32 %v2527_v4, %v2436_v27  ;;  %v591_v36 = vmul.f32 %v2530_v45, %v560_v33  ;;  %v640_v37 = vmul.f32 %v2533_v7, %v609_v34  ;;  %v689_v6 = vmul.f32 %v2536_v47, %v658_v56  ;;  %v2579_v34 = vld [vmem:[#allocation4 + $0x28] sm:$0xff] }
 0x1aa   :  { %v551_v5 = vadd.f32 %v543_v8, %v2424_v50  ;;  %v549_v22 = vmul.f32 %v2527_v4, %v2469_v16  ;;  %v598_v31 = vmul.f32 %v2530_v45, %v2464_v62  ;;  %v647_v33 = vmul.f32 %v2533_v7, %v2467_v42  ;;  %1093 = vperm.xlu1 %1874, %v2579_v34  }
 0x1ab   :  { %v550_v27 = vadd.f32 %v542_v23, %v2422_v58  ;;  %v696_v2 = vmul.f32 %v2536_v47, %v2478_v18  ;;  %v548_v50 = vmul.f32 %v2527_v4, %v2462_v3  ;;  %v597_v16 = vmul.f32 %v2530_v45, %v2476_v9 }
 0x1ac   :  { %v600_v29 = vadd.f32 %v592_v48, %v551_v5  ;;  %v557_v43 = vadd.f32 %v549_v22, %v2434_v24  ;;  %v646_v58 = vmul.f32 %v2533_v7, %v2474_v0  ;;  %v695_v42 = vmul.f32 %v2536_v47, %v2484_v12  ;;  %v2595_v5 = vld [vmem:[#allocation4 + $0x10] sm:$0xff] }
 0x1ad   :  { %v599_v62 = vadd.f32 %v591_v36, %v550_v27  ;;  %v556_v1 = vadd.f32 %v548_v50, %v2432_v54  ;;  %v547_v18 = vmul.f32 %v2527_v4, %v2454_v61  ;;  %v596_v24 = vmul.f32 %v2530_v45, %v2471_v63  ;;  %983 = vperm.xlu0 %1876, %v2595_v5   ;;  %v2601_v27 = vld [vmem:[#allocation4 + $0x30] sm:$0xff] }
 0x1ae   :  { %v649_v39 = vadd.f32 %v641_v28, %v600_v29  ;;  %v606_v3 = vadd.f32 %v598_v31, %v557_v43  ;;  %v645_v9 = vmul.f32 %v2533_v7, %v2480_v10  ;;  %v546_v61 = vmul.f32 %v2527_v4, %v2450_v30  ;;  %1097 = vperm.xlu2 %1870, %v2601_v27  }
 0x1af   :  { %v648_v0 = vadd.f32 %v640_v37, %v599_v62  ;;  %v605_v54 = vadd.f32 %v597_v16, %v556_v1  ;;  %v555_v12 = vadd.f32 %v547_v18, %v2430_v53  ;;  %v694_v28 = vmul.f32 %v2536_v47, %v2490_v20 }
 0x1b0   :  { %v698_v8 = vadd.f32 %v690_v26, %v649_v39  ;;  %v655_v48 = vadd.f32 %v647_v33, %v606_v3  ;;  %v595_v63 = vmul.f32 %v2530_v45, %v2482_v15  ;;  %v554_v36 = vadd.f32 %v546_v61, %v2452_v49  ;;  %v2621_v39 = vld [vmem:[#allocation4 + $0x38] sm:$0xff] }
 0x1b1   :  { %v697_v10 = vadd.f32 %v689_v6, %v648_v0  ;;  %v654_v56 = vadd.f32 %v646_v58, %v605_v54  ;;  %v604_v23 = vadd.f32 %v596_v24, %v555_v12  ;;  %v644_v30 = vmul.f32 %v2533_v7, %v2486_v13  ;;  %v2612_v58 = vld [vmem:[#allocation4 + $0x18] sm:$0xff] }
 0x1b2   :  { %v1771_v37 = vmul.f32 -1.442695, %v698_v8  ;;  %v704_v53 = vadd.f32 %v696_v2, %v655_v48  ;;  %v545_v26 = vmul.f32 %v2527_v4, %v2443_v60  ;;  %v603_v6 = vadd.f32 %v595_v63, %v554_v36  ;;  %1878 = vset.pattern.permute.xlu1 %v2139_v25  ;;  %v2643_v48 = vld [vmem:[#allocation4] sm:$0xff] }
 0x1b3   :  { %v703_v15 = vadd.f32 %v695_v42, %v654_v56  ;;  %v653_v20 = vadd.f32 %v645_v9, %v604_v23  ;;  %v693_v49 = vmul.f32 %v2536_v47, %v2500_v11  ;;  %v1770_v22 = vmul.f32 -1.442695, %v697_v10  ;;  %1036 = vperm.xlu1 %1878, %v2612_v58  }
 0x1b4   :  { %v1777_v31 = vmul.f32 -1.442695, %v704_v53  ;;  %v553_v60 = vadd.f32 %v545_v26, %v2428_v52  ;;  %v594_v13 = vmul.f32 %v2530_v45, %v2488_v14  ;;  %1953 = vpow2.f32 %v1771_v37  ;;  %v2661_v26 = vld [vmem:[#allocation4 + $0x8] sm:$0xff] }
 0x1b5   :  { %v1776_v33 = vmul.f32 -1.442695, %v703_v15  ;;  %v702_v2 = vadd.f32 %v694_v28, %v653_v20  ;;  %v652_v50 = vadd.f32 %v644_v30, %v603_v6  ;;  %v643_v11 = vmul.f32 %v2533_v7, %v2496_v59  ;;  %1877 = vset.pattern.permute.xlu0 %v2139_v25 }
 0x1b6   :  { %1955 = vpow2.f32 %v1777_v31  ;;  %v602_v29 = vadd.f32 %v594_v13, %v553_v60  ;;  %v544_v52 = vmul.f32 %v2527_v4, %v2441_v41  ;;  %v692_v62 = vmul.f32 %v2536_v47, %v2507_v51  ;;  %1052 = vperm.xlu0 %1877, %v2621_v39   ;;  %1873 = vset.pattern.permute.xlu2 %v2139_v25 }
 0x1b7   :  { %1957 = vpow2.f32 %v1776_v33  ;;  %v1775_v43 = vmul.f32 -1.442695, %v702_v2  ;;  %v701_v16 = vadd.f32 %v693_v49, %v652_v50  ;;  %v593_v42 = vmul.f32 %v2530_v45, %v2498_v46  ;;  %v2629_v45 = vld [vmem:[#allocation4 + $0x20] sm:$0xff] }
 0x1b8   :  { %1959 = vpow2.f32 %v1770_v22  ;;  %v651_v14 = vadd.f32 %v643_v11, %v602_v29  ;;  %v552_v59 = vadd.f32 %v544_v52, %v2426_v21  ;;  %v642_v51 = vmul.f32 %v2533_v7, %v2505_v19  ;;  %1040 = vperm.xlu2 %1873, %v2629_v45  }
 0x1b9   :  { %1961 = vpow2.f32 %v1775_v43  ;;  %v1774_v1 = vmul.f32 -1.442695, %v701_v16  ;;  %v691_v19 = vmul.f32 %v2536_v47, %v2516_v35 }
 0x1ba   :  { %v700_v18 = vadd.f32 %v692_v62, %v651_v14  ;;  %v1954_v41 = vpop.eup %1953  ;;  %v601_v4 = vadd.f32 %v593_v42, %v552_v59 }
 0x1bb   :  { %1963 = vpow2.f32 %v1774_v1  ;;  %v2632_v0 = vadd.f32 1.0, %v1954_v41  ;;  %1880 = vset.pattern.permute.xlu1 %v2137_v57 }
 0x1bc   :  { %v1956_v3 = vpop.eup %1955  ;;  %v1773_v46 = vmul.f32 -1.442695, %v700_v18  ;;  %v650_v12 = vadd.f32 %v642_v51, %v601_v4  ;;  %926 = vperm.xlu1 %1880, %v2643_v48  }
 0x1bd   :  { %v1958_v21 = vpop.eup %1957  ;;  %v2627_v24 = vadd.f32 1.0, %v1956_v3 }
 0x1be   :  { %v1960_v9 = vpop.eup %1959  ;;  %v2634_v54 = vadd.f32 1.0, %v1958_v21  ;;  %v699_v10 = vadd.f32 %v691_v19, %v650_v12  ;;  %1032 = vperm.xlu0 %1877, %v2595_v5  }
 0x1bf   :  { %v1962_v61 = vpop.eup %1961  ;;  %1965 = vrcp.f32 %v2627_v24  ;;  %v2647_v28 = vadd.f32 1.0, %v1960_v9  ;;  %v851_v35 = vand.u32 2147483647, %v2627_v24  ;;  %v853_v56 = vand.u32 2147483648, %v2627_v24 }
 0x1c0   :  { %1967 = vrcp.f32 %v2634_v54  ;;  %v2641_v8 = vadd.f32 1.0, %v1962_v61  ;;  %v836_v23 = vand.u32 2147483647, %v2634_v54  ;;  %v838_v36 = vand.u32 2147483648, %v2634_v54  ;;  %1875 = vset.pattern.permute.xlu2 %v2137_v57 }
 0x1c1   :  { %v1964_v7 = vpop.eup %1963  ;;  %1969 = vpow2.f32 %v1773_v46  ;;  %v1772_v37 = vmul.f32 -1.442695, %v699_v10  ;;  %930 = vperm.xlu2 %1875, %v2661_v26   ;;  %vm847_vm1 = vweird.f32 %v2627_v24  ;;  %vm2668_vm2 = vcmp.eq.f32.partialorder %v851_v35, 8.507059e+37 }
 0x1c2   :  { %1971 = vrcp.f32 %v2632_v0  ;;  %v2649_v63 = vadd.f32 1.0, %v1964_v7  ;;  %vm832_vm3 = vweird.f32 %v2634_v54  ;;  %v854_v60 = vor.u32 1.1754944e-38, %v853_v56 }
 0x1c3   :  { %1973 = vrcp.f32 %v2641_v8  ;;  %vm2675_vm4 = vcmp.eq.f32.partialorder %v836_v23, 8.507059e+37  ;;  %v839_v2 = vor.u32 1.1754944e-38, %v838_v36  ;;  %vm817_vm7 = vweird.f32 %v2641_v8 }
 0x1c4   :  { %1975 = vrcp.f32 %v2649_v63  ;;  %1882 = vset.pattern.permute.xlu1 %v2140_v55  ;;  %v821_v1 = vand.u32 2147483647, %v2641_v8  ;;  %v823_v59 = vand.u32 2147483648, %v2641_v8  ;;  %v808_v4 = vand.u32 2147483648, %v2649_v63 }
 0x1c5   :  { %v1966_v47 = vpop.eup %1965  ;;  %1977 = vrcp.f32 %v2647_v28  ;;  %1085 = vperm.xlu1 %1882, %v2612_v58   ;;  %vm802_vm12 = vweird.f32 %v2649_v63  ;;  %v806_v10 = vand.u32 2147483647, %v2649_v63 }
 0x1c6   :  { %v1968_v53 = vpop.eup %1967  ;;  %v843_v30 = vmul.f32 %v1966_v47, %v2627_v24  ;;  %1979 = vpow2.f32 %v1772_v37  ;;  %vm848_vm5 = vweird.f32 %v1966_v47  ;;  %1024 = vperm.xlu0 %1877, %v2643_v48   ;;  %v824_v7 = vor.u32 1.1754944e-38, %v823_v59 }
 0x1c7   :  { %v1970_v15 = vpop.eup %1969  ;;  %v828_v20 = vmul.f32 %v1968_v53, %v2634_v54  ;;  %vm833_vm6 = vweird.f32 %v1968_v53  ;;  %vm849_vm8 = vmor %vm847_vm1, %vm848_vm5  ;;  %vm822_vm14 = vcmp.eq.f32.partialorder %v821_v1, 8.507059e+37  ;;  %v809_v36 = vor.u32 1.1754944e-38, %v808_v4 }
 0x1c8   :  { %v2666_v6 = vpop.eup %1971  ;;  %v844_v49 = vsub.f32 1.0, %v843_v30  ;;  %v2673_v22 = vadd.f32 1.0, %v1970_v15  ;;  %vm2699_vm9 = vmor %vm832_vm3, %vm833_vm6  ;;  %vm807_vm1 = vcmp.eq.f32.partialorder %v806_v10, 8.507059e+37  ;;  %v763_v1 = vand.u32 2147483648, %v2632_v0 }
 0x1c9   :  { %v1974_v31 = vpop.eup %1973  ;;  %v829_v13 = vsub.f32 1.0, %v828_v20  ;;  %v753_v3 = vmul.f32 %v2666_v6, %v2632_v0  ;;  %1879 = vset.pattern.permute.xlu2 %v2140_v55  ;;  %vm758_vm6 = vweird.f32 %v2666_v6 }
 0x1ca   :  { %v1976_v50 = vpop.eup %1975  ;;  %v845_v29 = vmul.f32 %v1966_v47, %v844_v49  ;;  %v813_v11 = vmul.f32 %v1974_v31, %v2641_v8  ;;  %1981 = vrcp.f32 %v2673_v22  ;;  %vm818_vm10 = vweird.f32 %v1974_v31  ;;  %1089 = vperm.xlu2 %1879, %v2629_v45  }
 0x1cb   :  { %v830_v43 = vmul.f32 %v1968_v53, %v829_v13  ;;  %v798_v16 = vmul.f32 %v1976_v50, %v2649_v63  ;;  %v2686_v52 = vpop.eup %1977  ;;  %vm803_vm11 = vweird.f32 %v1976_v50  ;;  %vm819_vm13 = vmor %vm817_vm7, %vm818_vm10  ;;  %v754_v30 = vsub.f32 1.0, %v753_v3 }
 0x1cc   :  { %v846_v14 = vadd.f32 %v1966_v47, %v845_v29  ;;  %v814_v62 = vsub.f32 1.0, %v813_v11  ;;  %v1980_v42 = vpop.eup %1979  ;;  %vm804_vm15 = vmor %vm802_vm12, %vm803_vm11  ;;  %v738_v63 = vmul.f32 %v2686_v52, %v2647_v28  ;;  %v793_v15 = vand.u32 2147483648, %v2673_v22 }
 0x1cd   :  { %v831_v18 = vadd.f32 %v1968_v53, %v830_v43  ;;  %v799_v41 = vsub.f32 1.0, %v798_v16  ;;  %v2708_v61 = vadd.f32 1.0, %v1980_v42  ;;  %1883 = vset.pattern.permute.xlu1 %v2139_v25  ;;  %v791_v57 = vand.u32 2147483647, %v2673_v22 }
 0x1ce   :  { %v850_v51 = vsel %vm849_vm8, %v1966_v47, %v846_v14  ;;  %v815_v46 = vmul.f32 %v1974_v31, %v814_v62  ;;  %1028 = vperm.xlu1 %1883, %v2661_v26   ;;  %1886 = vset.pattern.permute.xlu0 %v3327_v40  ;;  %vm787_vm3 = vweird.f32 %v2673_v22  ;;  %v755_v13 = vmul.f32 %v2666_v6, %v754_v30 }
 0x1cf   :  { %v855_v24 = vsel %vm2668_vm2, %v854_v60, %v850_v51  ;;  %v835_v9 = vsel %vm2699_vm9, %v1968_v53, %v831_v18  ;;  %v800_v12 = vmul.f32 %v1976_v50, %v799_v41  ;;  %1983 = vrcp.f32 %v2708_v61 }
 0x1d0   :  { %v1982_v54 = vpop.eup %1981  ;;  %872 = vmatpush.msra.mxu1 %v855_v24  ;;  %v816_v19 = vadd.f32 %v1974_v31, %v815_v46  ;;  %v840_v35 = vsel %vm2675_vm4, %v839_v2, %v835_v9  ;;  %v794_v33 = vor.u32 1.1754944e-38, %v793_v15  ;;  %vm792_vm5 = vcmp.eq.f32.partialorder %v791_v57, 8.507059e+37 }
 0x1d1   :  { %v801_v47 = vadd.f32 %v1976_v50, %v800_v12  ;;  %v783_v56 = vmul.f32 %v1982_v54, %v2673_v22  ;;  %vm788_vm2 = vweird.f32 %v1982_v54  ;;  %v778_v16 = vand.u32 2147483648, %v2708_v61 }
 0x1d2   :  { %873 = vmatpush.msra.mxu1 %v840_v35  ;;  %v820_v23 = vsel %vm819_vm13, %v1974_v31, %v816_v19  ;;  %v739_v31 = vsub.f32 1.0, %v738_v63  ;;  %1881 = vset.pattern.permute.xlu2 %v2138_v38  ;;  %vm789_vm4 = vmor %vm787_vm3, %vm788_vm2  ;;  %v756_v22 = vadd.f32 %v2666_v6, %v755_v13  ;;  %v776_v14 = vand.u32 2147483647, %v2708_v61 }
 0x1d3   :  { %v825_v37 = vsel %vm822_vm14, %v824_v7, %v820_v23  ;;  %v805_v53 = vsel %vm804_vm15, %v1976_v50, %v801_v47  ;;  %v784_v8 = vsub.f32 1.0, %v783_v56  ;;  %979 = vperm.xlu2 %1881, %v2661_v26   ;;  %vm757_vm8 = vweird.f32 %v2632_v0 }
 0x1d4   :  { %874 = vmatpush.msra.mxu1 %v825_v37  ;;  %v810_v20 = vsel %vm807_vm1, %v809_v36, %v805_v53  ;;  %v740_v43 = vmul.f32 %v2686_v52, %v739_v31  ;;  %v761_v62 = vand.u32 2147483647, %v2632_v0  ;;  %vm772_vm9 = vweird.f32 %v2708_v61  ;;  %vm2744_vm10 = vmor %vm757_vm8, %vm758_vm6 }
 0x1d5   :  { %v785_v49 = vmul.f32 %v1982_v54, %v784_v8  ;;  %v1984_v25 = vpop.eup %1983  ;;  %vm743_vm11 = vweird.f32 %v2686_v52  ;;  %v779_v41 = vor.u32 1.1754944e-38, %v778_v16  ;;  %v760_v4 = vsel %vm2744_vm10, %v2666_v6, %v756_v22  ;;  %v2795_v8 = vpop.permute.xlu0 %898 }
 0x1d6   :  { %875 = vmatpush.msra.mxu1 %v810_v20  ;;  %v768_v2 = vmul.f32 %v1984_v25, %v2708_v61  ;;  %1885 = vset.pattern.permute.xlu1 %v2140_v55  ;;  %vm773_vm7 = vweird.f32 %v1984_v25  ;;  %v741_v18 = vadd.f32 %v2686_v52, %v740_v43  ;;  %v748_v3 = vand.u32 2147483648, %v2647_v28  ;;  %v860_v61 = vpop.permute.xlu1 %859 }
 0x1d7   :  { %v786_v60 = vadd.f32 %v1982_v54, %v785_v49  ;;  %1077 = vperm.xlu1 %1885, %v2661_v26   ;;  %vm774_vm12 = vmor %vm772_vm9, %vm773_vm7  ;;  %vm777_vm13 = vcmp.eq.f32.partialorder %v776_v14, 8.507059e+37  ;;  %vm742_vm14 = vweird.f32 %v2647_v28  ;;  %v746_v51 = vand.u32 2147483647, %v2647_v28  ;;  %v2760_v28 = vpop.permute.xlu2 %894 }
 0x1d8   :  { %v769_v11 = vsub.f32 1.0, %v768_v2  ;;  %v764_v46 = vor.u32 1.1754944e-38, %v763_v1  ;;  %vm744_vm15 = vmor %vm742_vm14, %vm743_vm11  ;;  %vm762_vm1 = vcmp.eq.f32.partialorder %v761_v62, 8.507059e+37  ;;  %v749_v12 = vor.u32 1.1754944e-38, %v748_v3  ;;  %v2831_v3 = vld [vmem:[#allocation4 + $0x50] sm:$0xff] }
 0x1d9   :  { %v790_v50 = vsel %vm789_vm4, %v1982_v54, %v786_v60  ;;  %v745_v24 = vsel %vm744_vm15, %v2686_v52, %v741_v18  ;;  %vm747_vm2 = vcmp.eq.f32.partialorder %v746_v51, 8.507059e+37  ;;  %v2141_v7 = vmov 15   ;;  %1275 = vperm.xlu0 %1886, %v2831_v3  }
 0x1da   :  { %v795_v29 = vsel %vm792_vm5, %v794_v33, %v790_v50  ;;  %v770_v38 = vmul.f32 %v1984_v25, %v769_v11  ;;  %v765_v9 = vsel %vm762_vm1, %v764_v46, %v760_v4  ;;  %v750_v6 = vsel %vm747_vm2, %v749_v12, %v745_v24 }
 0x1db   :  { %876 = vmatpush.msra.mxu1 %v795_v29  ;;  %975 = vperm.xlu2 %1881, %v2643_v48   ;;  %v2142_v56 = vmov 17   ;;  %v3333_v11 = vmov 19   ;;  %v3331_v43 = vmov 16   ;;  %v3329_v14 = vmov 18  }
 0x1dc   :  { %v771_v59 = vadd.f32 %v1984_v25, %v770_v38 }
 0x1dd   :  { %v2801_v20 = vpop.permute.xlu0 %922 }
 0x1de   :  { %v775_v0 = vsel %vm774_vm12, %v1984_v25, %v771_v59  ;;  %v2764_v54 = vpop.permute.xlu1 %902 }
 0x1df   :  { %v780_v21 = vsel %vm777_vm13, %v779_v41, %v775_v0  ;;  %v2766_v19 = vpop.permute.xlu2 %906  ;;  %1887 = vset.pattern.permute.xlu1 %v2141_v7  ;;  %v2063_v0 = vld [vmem:[#allocation2] sm:$0xf] }
 0x1e0   :  { %877 = vmatpush.msra.mxu1 %v780_v21  ;;  %1370 = vperm.xlu1 %1887, %v2621_v39  }
 0x1e1   :  { %1892 = vset.pattern.permute.xlu0 %v2141_v7 }
 0x1e2   :  { %878 = vmatpush.msra.mxu1 %v765_v9  ;;  %1358 = vperm.xlu0 %1892, %v2629_v45  }
 0x1e3   :  { %1884 = vset.pattern.permute.xlu2 %v2140_v55 }
 0x1e4   :  { %879 = vmatpush.msra.mxu1 %v750_v6  ;;  %1081 = vperm.xlu2 %1884, %v2595_v5  }
 0x1e5   :  { %1778 = vmatmul.msk.f32.vlgmr.msra.gmra.mxu1 %vm445_vm0, %v2438_v32  ;;  %v2805_v31 = vpop.permute.xlu0 %918 }
 0x1e6   :  { %v2769_v52 = vpop.permute.xlu1 %910 }
 0x1e7   :  { %v2773_v32 = vpop.permute.xlu2 %954 }
 0x1e8   :  { %1366 = vperm.xlu1 %1887, %v2601_v27  }
 0x1ea   :  { %1354 = vperm.xlu0 %1892, %v2612_v58  }
 0x1ec   :  { %1073 = vperm.xlu2 %1884, %v2643_v48  }
 0x1ed   :  { %v1102_v60 = vpop.permute.xlu0 %1101 }
 0x1ee   :  { %v2776_v55 = vpop.permute.xlu1 %950 }
 0x1ef   :  { %v2778_v10 = vpop.permute.xlu2 %1003 }
 0x1f0   :  { %1362 = vperm.xlu1 %1887, %v2579_v34  }
 0x1f4   :  { %1888 = vset.pattern.permute.xlu2 %v3333_v11 }
 0x1f5   :  { %v2811_v2 = vpop.permute.xlu0 %934  ;;  %1338 = vperm.xlu2 %1888, %v2621_v39  }
 0x1f6   :  { %v2781_v35 = vpop.permute.xlu1 %946 }
 0x1f7   :  { %v2783_v47 = vpop.permute.xlu2 %999 }
 0x1f8   :  { %1890 = vset.pattern.permute.xlu1 %v2142_v56 }
 0x1f9   :  { %1468 = vperm.xlu1 %1890, %v2621_v39  }
 0x1fd   :  { %1889 = vset.pattern.permute.xlu2 %v3331_v43 }
 0x1fe   :  { %v2787_v23 = vpop.permute.xlu1 %914  ;;  %1419 = vperm.xlu2 %1889, %v2621_v39  }
 0x1ff   :  { %v2789_v36 = vpop.permute.xlu2 %942 }
 0x201   :  { %1893 = vset.pattern.permute.xlu1 %v3331_v43 }
 0x202   :  { %1411 = vperm.xlu1 %1893, %v2579_v34  }
 0x206   :  { %v2791_v63 = vpop.permute.xlu1 %995  ;;  %1415 = vperm.xlu2 %1889, %v2601_v27  }
 0x207   :  { %v2793_v37 = vpop.permute.xlu2 %1048 }
 0x20a   :  { %1895 = vset.pattern.permute.xlu1 %v3329_v14 }
 0x20b   :  { %1517 = vperm.xlu1 %1895, %v2621_v39  }
 0x20e   :  { %v939_v53 = vpop.permute.xlu1 %938  ;;  %1891 = vset.pattern.permute.xlu2 %v3333_v11 }
 0x20f   :  { %v2797_v30 = vpop.permute.xlu2 %991  ;;  %1330 = vperm.xlu2 %1891, %v2579_v34  }
 0x213   :  { %1897 = vset.pattern.permute.xlu1 %v3331_v43 }
 0x214   :  { %1407 = vperm.xlu1 %1897, %v2629_v45  }
 0x216   :  { %v2799_v15 = vpop.permute.xlu1 %1044 }
 0x217   :  { %v2803_v49 = vpop.permute.xlu2 %1097  ;;  %1894 = vset.pattern.permute.xlu2 %v2142_v56 }
 0x218   :  { %1464 = vperm.xlu2 %1894, %v2601_v27  }
 0x21c   :  { %1899 = vset.pattern.permute.xlu1 %v3333_v11 }
 0x21d   :  { %1322 = vperm.xlu1 %1899, %v2612_v58  }
 0x21e   :  { %v988_v57 = vpop.permute.xlu1 %987 }
 0x21f   :  { %v2807_v25 = vpop.permute.xlu2 %1040  ;;  %v2819_v16 = vpop.permute.xlu0 %983 }
 0x226   :  { %v2809_v13 = vpop.permute.xlu1 %1093 }
 0x227   :  { %v931_v33 = vpop.permute.xlu2 %930 }
 0x228   :  { %v1053_v59 = vpop.permute.xlu0 %1052 }
 0x22e   :  { %v1037_v50 = vpop.permute.xlu1 %1036 }
 0x22f   :  { %v2813_v29 = vpop.permute.xlu2 %1089 }
 0x230   :  { %v1033_v21 = vpop.permute.xlu0 %1032 }
 0x236   :  { %v927_v22 = vpop.permute.xlu1 %926 }
 0x237   :  { %v980_v38 = vpop.permute.xlu2 %979 }
 0x23e   :  { %v1086_v18 = vpop.permute.xlu1 %1085 }
 0x23f   :  { %v976_v41 = vpop.permute.xlu2 %975 }
 0x246   :  { %v1029_v46 = vpop.permute.xlu1 %1028 }
 0x247   :  { %v1082_v9 = vpop.permute.xlu2 %1081 }
 0x262   :  { %v881_v62 = vpop.f32.mrf.mxu1 }
 0x263   :  { %v2825_v1 = vadd.f32 %v881_v62, %v860_v61 }
 0x265   :  { %v884_v42 = vmul.f32 1.442695, %v2825_v1  ;;  %v888_v51 = vrot.slane %v2825_v1, 4 }
 0x267   :  { %1985 = vpow2.f32 %v884_v42 }
 0x26d   :  { %v1986_v4 = vpop.eup %1985 }
 0x26e   :  { %v886_v39 = vmul.f32 %v2063_v0, %v1986_v4 }
 0x270   :  { %v2836_v24 = vadd.f32 %v888_v51, %v886_v39 }
 0x272   :  { %v2840_v12 = vperm.slane %v2836_v24, 0  ;;  %v2843_v6 = vperm.slane %v2836_v24, 1  ;;  %v2846_v61 = vperm.slane %v2836_v24, 2  ;;  %v2849_v62 = vperm.slane %v2836_v24, 3 }
 0x274   :  { %v961_v42 = vmul.f32 %v2840_v12, %v939_v53  ;;  %v1010_v4 = vmul.f32 %v2843_v6, %v988_v57  ;;  %v1059_v0 = vmul.f32 %v2846_v61, %v1037_v50  ;;  %v1108_v39 = vmul.f32 %v2849_v62, %v1086_v18 }
 0x275   :  { %v958_v51 = vmul.f32 %v2840_v12, %v927_v22  ;;  %v965_v40 = vmul.f32 %v2840_v12, %v2773_v32  ;;  %v1007_v43 = vmul.f32 %v2843_v6, %v976_v41  ;;  %v1014_v11 = vmul.f32 %v2843_v6, %v2778_v10 }
 0x276   :  { %v969_v14 = vadd.f32 %v961_v42, %v2766_v19  ;;  %v959_v53 = vmul.f32 %v2840_v12, %v931_v33  ;;  %v1063_v22 = vmul.f32 %v2846_v61, %v1053_v59  ;;  %v1112_v18 = vmul.f32 %v2849_v62, %v1102_v60  ;;  %v1025_v33 = vpop.permute.xlu0 %1024  ;;  %v1078_v60 = vpop.permute.xlu1 %1077 }
 0x277   :  { %v966_v57 = vadd.f32 %v958_v51, %v2760_v28  ;;  %v973_v50 = vadd.f32 %v965_v40, %v2801_v20  ;;  %v1008_v41 = vmul.f32 %v2843_v6, %v980_v38  ;;  %v960_v10 = vmul.f32 %v2840_v12, %v2811_v2  ;;  %v1074_v51 = vpop.permute.xlu2 %1073 }
 0x278   :  { %v1018_v19 = vadd.f32 %v1010_v4, %v969_v14  ;;  %v967_v32 = vadd.f32 %v959_v53, %v2795_v8  ;;  %v1057_v40 = vmul.f32 %v2846_v61, %v1029_v46  ;;  %v1107_v20 = vmul.f32 %v2849_v62, %v1082_v9 }
 0x279   :  { %v1015_v28 = vadd.f32 %v1007_v43, %v966_v57  ;;  %v1022_v42 = vadd.f32 %v1014_v11, %v973_v50  ;;  %v968_v8 = vadd.f32 %v960_v10, %v2764_v54  ;;  %v1009_v38 = vmul.f32 %v2843_v6, %v2819_v16 }
 0x27a   :  { %v1067_v14 = vadd.f32 %v1059_v0, %v1018_v19  ;;  %v1016_v59 = vadd.f32 %v1008_v41, %v967_v32  ;;  %v1058_v4 = vmul.f32 %v2846_v61, %v1033_v21  ;;  %v1056_v11 = vmul.f32 %v2846_v61, %v1025_v33 }
 0x27b   :  { %v1071_v2 = vadd.f32 %v1063_v22, %v1022_v42  ;;  %v3347_v43 = vmov 16   ;;  %v964_v46 = vmul.f32 %v2840_v12, %v2776_v55  ;;  %v1017_v0 = vadd.f32 %v1009_v38, %v968_v8 }
 0x27c   :  { %1901 = vset.pattern.permute.xlu1 %v3347_v43  ;;  %v1116_v9 = vadd.f32 %v1108_v39, %v1067_v14  ;;  %v1065_v53 = vadd.f32 %v1057_v40, %v1016_v59  ;;  %v1106_v57 = vmul.f32 %v2849_v62, %v1078_v60  ;;  %v1064_v16 = vadd.f32 %v1056_v11, %v1015_v28 }
 0x27d   :  { %1403 = vperm.xlu1 %1901, %v2612_v58   ;;  %v1120_v54 = vadd.f32 %v1112_v18, %v1071_v2  ;;  %v972_v50 = vadd.f32 %v964_v46, %v2805_v31  ;;  %v1013_v21 = vmul.f32 %v2843_v6, %v2783_v47  ;;  %v1066_v19 = vadd.f32 %v1058_v4, %v1017_v0 }
 0x27e   :  { %v1782_v22 = vmul.f32 -1.442695, %v1116_v9  ;;  %v1114_v32 = vadd.f32 %v1106_v57, %v1065_v53  ;;  %v1105_v41 = vmul.f32 %v2849_v62, %v1074_v51  ;;  %v1062_v10 = vmul.f32 %v2846_v61, %v2793_v37  ;;  %1905 = vset.pattern.permute.xlu0 %v3347_v43 }
 0x27f   :  { %v1786_v55 = vmul.f32 -1.442695, %v1120_v54  ;;  %v1021_v39 = vadd.f32 %v1013_v21, %v972_v50  ;;  %v963_v18 = vmul.f32 %v2840_v12, %v2781_v35  ;;  %v1115_v31 = vadd.f32 %v1107_v20, %v1066_v19  ;;  %1399 = vperm.xlu0 %1905, %v2595_v5  }
 0x280   :  { %1987 = vpow2.f32 %v1782_v22  ;;  %v1113_v33 = vadd.f32 %v1105_v41, %v1064_v16  ;;  %v1111_v47 = vmul.f32 %v2849_v62, %v2803_v49  ;;  %v3348_v28 = vmov 19  }
 0x281   :  { %1989 = vpow2.f32 %v1786_v55  ;;  %1896 = vset.pattern.permute.xlu2 %v3348_v28  ;;  %v1070_v42 = vadd.f32 %v1062_v10, %v1021_v39  ;;  %v971_v40 = vadd.f32 %v963_v18, %v2787_v23  ;;  %v1012_v60 = vmul.f32 %v2843_v6, %v2791_v63 }
 0x282   :  { %v1781_v14 = vmul.f32 -1.442695, %v1115_v31  ;;  %v1780_v37 = vmul.f32 -1.442695, %v1114_v32  ;;  %1326 = vperm.xlu2 %1896, %v2629_v45   ;;  %v1061_v20 = vmul.f32 %v2846_v61, %v2799_v15  ;;  %v962_v49 = vmul.f32 %v2840_v12, %v2789_v36 }
 0x283   :  { %v1119_v35 = vadd.f32 %v1111_v47, %v1070_v42  ;;  %v1020_v59 = vadd.f32 %v1012_v60, %v971_v40  ;;  %v1779_v8 = vmul.f32 -1.442695, %v1113_v33  ;;  %v1110_v23 = vmul.f32 %v2849_v62, %v2809_v13 }
 0x284   :  { %1991 = vpow2.f32 %v1781_v14  ;;  %v970_v2 = vadd.f32 %v962_v49, %v2769_v52  ;;  %v1011_v4 = vmul.f32 %v2843_v6, %v2797_v30  ;;  %v1060_v13 = vmul.f32 %v2846_v61, %v2807_v25 }
 0x285   :  { %1903 = vset.pattern.permute.xlu1 %v3348_v28  ;;  %v1785_v63 = vmul.f32 -1.442695, %v1119_v35  ;;  %v1069_v38 = vadd.f32 %v1061_v20, %v1020_v59  ;;  %1993 = vpow2.f32 %v1780_v37  ;;  %v1109_v30 = vmul.f32 %v2849_v62, %v2813_v29 }
 0x286   :  { %1318 = vperm.xlu1 %1903, %v2595_v5   ;;  %v1988_v15 = vpop.eup %1987  ;;  %v1019_v12 = vadd.f32 %v1011_v4, %v970_v2 }
 0x287   :  { %v1990_v51 = vpop.eup %1989  ;;  %1995 = vpow2.f32 %v1785_v63  ;;  %v1118_v36 = vadd.f32 %v1110_v23, %v1069_v38  ;;  %v2920_v46 = vadd.f32 1.0, %v1988_v15  ;;  %1395 = vperm.xlu0 %1905, %v2661_v26  }
 0x288   :  { %v1152_v11 = vadd.f32 1.0, %v1990_v51  ;;  %1997 = vpow2.f32 %v1779_v8  ;;  %v1068_v52 = vadd.f32 %v1060_v13, %v1019_v12 }
 0x289   :  { %v1784_v9 = vmul.f32 -1.442695, %v1118_v36  ;;  %v1207_v2 = vand.u32 2147483647, %v2920_v46  ;;  %v1209_v4 = vand.u32 2147483648, %v2920_v46  ;;  %vm1203_vm10 = vweird.f32 %v2920_v46 }
 0x28a   :  { %v1992_v6 = vpop.eup %1991  ;;  %1999 = vrcp.f32 %v1152_v11  ;;  %1898 = vset.pattern.permute.xlu2 %v2142_v56  ;;  %v1117_v53 = vadd.f32 %v1109_v30, %v1068_v52  ;;  %v1267_v19 = vand.u32 2147483647, %v1152_v11  ;;  %v1269_v32 = vand.u32 2147483648, %v1152_v11 }
 0x28b   :  { %1460 = vperm.xlu2 %1898, %v2579_v34   ;;  %v1994_v0 = vpop.eup %1993  ;;  %2001 = vrcp.f32 %v2920_v46  ;;  %v2927_v61 = vadd.f32 1.0, %v1992_v6  ;;  %vm1263_vm4 = vweird.f32 %v1152_v11  ;;  %vm2990_vm15 = vcmp.eq.f32.partialorder %v1207_v2, 8.507059e+37  ;;  %v2064_v2 = vld [vmem:[#allocation4 + $0x30] sm:$0xff] }
 0x28c   :  { %v1783_v57 = vmul.f32 -1.442695, %v1117_v53  ;;  %2003 = vpow2.f32 %v1784_v9  ;;  %v2933_v29 = vadd.f32 1.0, %v1994_v0  ;;  %v1270_v42 = vor.u32 1.1754944e-38, %v1269_v32 }
 0x28d   :  { %v1996_v25 = vpop.eup %1995  ;;  %vm1268_vm6 = vcmp.eq.f32.partialorder %v1267_v19, 8.507059e+37  ;;  %v1192_v30 = vand.u32 2147483647, %v2927_v61  ;;  %vm1188_vm12 = vweird.f32 %v2927_v61 }
 0x28e   :  { %1906 = vset.pattern.permute.xlu1 %v2142_v56  ;;  %v1998_v54 = vpop.eup %1997  ;;  %v2930_v16 = vadd.f32 1.0, %v1996_v25  ;;  %2005 = vpow2.f32 %v1783_v57 }
 0x28f   :  { %1452 = vperm.xlu1 %1906, %v2612_v58   ;;  %v2938_v62 = vadd.f32 1.0, %v1998_v54  ;;  %1910 = vset.pattern.permute.xlu0 %v3348_v28 }
 0x290   :  { %v2000_v34 = vpop.eup %1999  ;;  %2007 = vrcp.f32 %v2930_v16  ;;  %1334 = vperm.xlu0 %1910, %v2601_v27   ;;  %v1254_v59 = vand.u32 2147483648, %v2930_v16  ;;  %vm1248_vm8 = vweird.f32 %v2930_v16 }
 0x291   :  { %2009 = vrcp.f32 %v2927_v61  ;;  %v1259_v50 = vmul.f32 %v2000_v34, %v1152_v11  ;;  %v2940_v21 = vpop.eup %2001  ;;  %vm1264_vm3 = vweird.f32 %v2000_v34 }
 0x292   :  { %2011 = vrcp.f32 %v2933_v29  ;;  %v2004_v58 = vpop.eup %2003  ;;  %vm1265_vm5 = vmor %vm1263_vm4, %vm1264_vm3  ;;  %v1199_v40 = vmul.f32 %v2940_v21, %v2920_v46  ;;  %v1255_v51 = vor.u32 1.1754944e-38, %v1254_v59  ;;  %vm1204_vm13 = vweird.f32 %v2940_v21 }
 0x293   :  { %v1260_v22 = vsub.f32 1.0, %v1259_v50  ;;  %1900 = vset.pattern.permute.xlu2 %v2141_v7  ;;  %2013 = vrcp.f32 %v2938_v62  ;;  %v2946_v39 = vadd.f32 1.0, %v2004_v58  ;;  %v1194_v59 = vand.u32 2147483648, %v2927_v61 }
 0x294   :  { %1350 = vperm.xlu2 %1900, %v2595_v5   ;;  %v2006_v41 = vpop.eup %2005  ;;  %v1200_v23 = vsub.f32 1.0, %v1199_v40  ;;  %v1177_v46 = vand.u32 2147483647, %v2933_v29 }
 0x295   :  { %v1261_v55 = vmul.f32 %v2000_v34, %v1260_v22  ;;  %v2948_v18 = vadd.f32 1.0, %v2006_v41  ;;  %2015 = vrcp.f32 %v2946_v39  ;;  %v1237_v25 = vand.u32 2147483647, %v2946_v39 }
 0x296   :  { %v2008_v10 = vpop.eup %2007  ;;  %v1201_v53 = vmul.f32 %v2940_v21, %v1200_v23  ;;  %v1239_v57 = vand.u32 2147483648, %v2946_v39  ;;  %vm1233_vm1 = vweird.f32 %v2946_v39  ;;  %v1210_v23 = vor.u32 1.1754944e-38, %v1209_v4 }
 0x297   :  { %1908 = vset.pattern.permute.xlu1 %v3348_v28  ;;  %v2951_v31 = vpop.eup %2009  ;;  %v1262_v33 = vadd.f32 %v2000_v34, %v1261_v55  ;;  %v1244_v47 = vmul.f32 %v2008_v10, %v2930_v16  ;;  %2017 = vrcp.f32 %v2948_v18  ;;  %vm1249_vm7 = vweird.f32 %v2008_v10 }
 0x298   :  { %1314 = vperm.xlu1 %1908, %v2661_v26   ;;  %v2960_v60 = vpop.eup %2011  ;;  %v1184_v20 = vmul.f32 %v2951_v31, %v2927_v61  ;;  %v1252_v28 = vand.u32 2147483647, %v2930_v16  ;;  %vm1250_vm9 = vmor %vm1248_vm8, %vm1249_vm7  ;;  %1310 = vperm.xlu0 %1910, %v2643_v48   ;;  %v1224_v58 = vand.u32 2147483648, %v2948_v18  ;;  %v1222_v32 = vand.u32 2147483647, %v2948_v18 }
 0x299   :  { %v1266_v14 = vsel %vm1265_vm5, %v2000_v34, %v1262_v33  ;;  %v1245_v37 = vsub.f32 1.0, %v1244_v47  ;;  %v2966_v49 = vpop.eup %2013  ;;  %v1169_v63 = vmul.f32 %v2960_v60, %v2933_v29  ;;  %v1202_v41 = vadd.f32 %v2940_v21, %v1201_v53  ;;  %vm3016_vm8 = vmor %vm1203_vm10, %vm1204_vm13  ;;  %v1276_v34 = vpop.permute.xlu0 %1275 }
 0x29a   :  { %v1271_v35 = vsel %vm1268_vm6, %v1270_v42, %v1266_v14  ;;  %v1185_v12 = vsub.f32 1.0, %v1184_v20  ;;  %v1154_v13 = vmul.f32 %v2966_v49, %v2938_v62  ;;  %vm1253_vm11 = vcmp.eq.f32.partialorder %v1252_v28, 8.507059e+37 }
 0x29b   :  { %1288 = vmatpush.msra.mxu2 %v1271_v35  ;;  %v1246_v8 = vmul.f32 %v2008_v10, %v1245_v37  ;;  %v2016_v27 = vpop.eup %2015  ;;  %v1170_v0 = vsub.f32 1.0, %v1169_v63  ;;  %vm1218_vm4 = vweird.f32 %v2948_v18  ;;  %vm1189_vm5 = vweird.f32 %v2951_v31 }
 0x29c   :  { %1902 = vset.pattern.permute.xlu2 %v2142_v56  ;;  %v1229_v36 = vmul.f32 %v2016_v27, %v2946_v39  ;;  %vm1234_vm14 = vweird.f32 %v2016_v27  ;;  %v1186_v50 = vmul.f32 %v2951_v31, %v1185_v12  ;;  %v1155_v22 = vsub.f32 1.0, %v1154_v13  ;;  %vm3033_vm10 = vmor %vm1188_vm12, %vm1189_vm5 }
 0x29d   :  { %v1247_v38 = vadd.f32 %v2008_v10, %v1246_v8  ;;  %1456 = vperm.xlu2 %1902, %v2629_v45   ;;  %v2018_v15 = vpop.eup %2017  ;;  %v1171_v55 = vmul.f32 %v2960_v60, %v1170_v0  ;;  %vm1235_vm3 = vmor %vm1233_vm1, %vm1234_vm14  ;;  %vm1238_vm6 = vcmp.eq.f32.partialorder %v1237_v25, 8.507059e+37  ;;  %v1225_v37 = vor.u32 1.1754944e-38, %v1224_v58 }
 0x29e   :  { %v1214_v52 = vmul.f32 %v2018_v15, %v2948_v18  ;;  %v1230_v9 = vsub.f32 1.0, %v1229_v36  ;;  %vm1219_vm2 = vweird.f32 %v2018_v15  ;;  %v1187_v42 = vadd.f32 %v2951_v31, %v1186_v50 }
 0x29f   :  { %v1251_v11 = vsel %vm1250_vm9, %v2008_v10, %v1247_v38  ;;  %v1240_v10 = vor.u32 1.1754944e-38, %v1239_v57  ;;  %vm3003_vm7 = vmor %vm1218_vm4, %vm1219_vm2  ;;  %v1156_v40 = vmul.f32 %v2966_v49, %v1155_v22  ;;  %vm1223_vm9 = vcmp.eq.f32.partialorder %v1222_v32, 8.507059e+37 }
 0x2a0   :  { %1911 = vset.pattern.permute.xlu1 %v2142_v56  ;;  %v1256_v6 = vsel %vm1253_vm11, %v1255_v51, %v1251_v11  ;;  %v1215_v54 = vsub.f32 1.0, %v1214_v52  ;;  %v1231_v16 = vmul.f32 %v2016_v27, %v1230_v9  ;;  %v1206_v20 = vsel %vm3016_vm8, %v2940_v21, %v1202_v41 }
 0x2a1   :  { %1448 = vperm.xlu1 %1911, %v2595_v5   ;;  %1289 = vmatpush.msra.mxu2 %v1256_v6  ;;  %v1172_v8 = vadd.f32 %v2960_v60, %v1171_v55  ;;  %vm1174_vm11 = vweird.f32 %v2960_v60  ;;  %vm1173_vm13 = vweird.f32 %v2933_v29  ;;  %v1179_v21 = vand.u32 2147483648, %v2933_v29 }
 0x2a2   :  { %v1216_v5 = vmul.f32 %v2018_v15, %v1215_v54  ;;  %v1232_v19 = vadd.f32 %v2016_v27, %v1231_v16  ;;  %v1157_v38 = vadd.f32 %v2966_v49, %v1156_v40  ;;  %vm1159_vm12 = vweird.f32 %v2966_v49  ;;  %vm1175_vm14 = vmor %vm1173_vm13, %vm1174_vm11 }
 0x2a3   :  { %v1211_v4 = vsel %vm2990_vm15, %v1210_v23, %v1206_v20  ;;  %v1164_v51 = vand.u32 2147483648, %v2938_v62  ;;  %vm1193_vm1 = vcmp.eq.f32.partialorder %v1192_v30, 8.507059e+37  ;;  %v1176_v29 = vsel %vm1175_vm14, %v2960_v60, %v1172_v8  ;;  %v2066_v60 = vld [vmem:[#allocation4 + $0x28] sm:$0xff]  ;;  %v3070_v30 = vpop.permute.xlu2 %1338 }
 0x2a4   :  { %v1217_v33 = vadd.f32 %v2018_v15, %v1216_v5  ;;  %v1236_v39 = vsel %vm1235_vm3, %v2016_v27, %v1232_v19  ;;  %v3357_v27 = vmov 18   ;;  %vm1158_vm2 = vweird.f32 %v2938_v62  ;;  %v3094_v5 = vpop.permute.xlu0 %1358 }
 0x2a5   :  { %1904 = vset.pattern.permute.xlu2 %v2141_v7  ;;  %v1241_v14 = vsel %vm1238_vm6, %v1240_v10, %v1236_v39  ;;  %1913 = vset.pattern.permute.xlu0 %v3357_v27  ;;  %v1180_v12 = vor.u32 1.1754944e-38, %v1179_v21  ;;  %vm1160_vm3 = vmor %vm1158_vm2, %vm1159_vm12  ;;  %vm1178_vm15 = vcmp.eq.f32.partialorder %v1177_v46, 8.507059e+37  ;;  %v1165_v52 = vor.u32 1.1754944e-38, %v1164_v51 }
 0x2a6   :  { %1346 = vperm.xlu2 %1904, %v2661_v26   ;;  %v1221_v18 = vsel %vm3003_vm7, %v2018_v15, %v1217_v33  ;;  %1290 = vmatpush.msra.mxu2 %v1241_v14  ;;  %v1195_v15 = vor.u32 1.1754944e-38, %v1194_v59  ;;  %v1161_v13 = vsel %vm1160_vm3, %v2966_v49, %v1157_v38  ;;  %v3065_v49 = vpop.permute.xlu1 %1370  ;;  %v891_v20 = vadd.f32 %v2825_v1, %v2509_v17 }
 0x2a7   :  { %v1226_v28 = vsel %vm1223_vm9, %v1225_v37, %v1221_v18  ;;  %1513 = vperm.xlu0 %1913, %v2064_v2   ;;  %v1181_v11 = vsel %vm1178_vm15, %v1180_v12, %v1176_v29 }
 0x2a8   :  { %1291 = vmatpush.msra.mxu2 %v1226_v28 }
 0x2a9   :  { %1914 = vset.pattern.permute.xlu1 %v3347_v43  ;;  %v1191_v43 = vsel %vm3033_vm10, %v2951_v31, %v1187_v42  ;;  %v1162_v31 = vand.u32 2147483647, %v2938_v62  ;;  %v2065_v62 = vld [vmem:[#allocation4 + $0x10] sm:$0xff] }
 0x2aa   :  { %1391 = vperm.xlu1 %1914, %v2643_v48   ;;  %1292 = vmatpush.msra.mxu2 %v1211_v4  ;;  %v1196_v36 = vsel %vm1193_vm1, %v1195_v15, %v1191_v43 }
 0x2ab   :  { %vm1163_vm4 = vcmp.eq.f32.partialorder %v1162_v31, 8.507059e+37 }
 0x2ac   :  { %1293 = vmatpush.msra.mxu2 %v1196_v36  ;;  %v1166_v61 = vsel %vm1163_vm4, %v1165_v52, %v1161_v13  ;;  %v1355_v32 = vpop.permute.xlu0 %1354 }
 0x2ae   :  { %1907 = vset.pattern.permute.xlu2 %v3357_v27  ;;  %1294 = vmatpush.msra.mxu2 %v1181_v11  ;;  %v1367_v6 = vpop.permute.xlu1 %1366 }
 0x2af   :  { %1505 = vperm.xlu2 %1907, %v2629_v45   ;;  %1509 = vperm.xlu0 %1913, %v2066_v60   ;;  %v2067_v45 = vld [vmem:[#allocation4 + $0x18] sm:$0xff] }
 0x2b0   :  { %1295 = vmatpush.msra.mxu2 %v1166_v61 }
 0x2b1   :  { %1787 = vmatmul.msk.f32.vlgmr.msra.gmra.mxu2 %vm445_vm0, %v2831_v3  ;;  %v3358_v3 = vmov 64  }
 0x2b2   :  { %1916 = vset.pattern.permute.xlu1 %v3357_v27 }
 0x2b3   :  { %1497 = vperm.xlu1 %1916, %v2065_v62  }
 0x2b6   :  { %v3077_v9 = vpop.permute.xlu1 %1362 }
 0x2b7   :  { %1909 = vset.pattern.permute.xlu2 %v2141_v7  ;;  %1493 = vperm.xlu0 %1913, %v2661_v26   ;;  %v3075_v7 = vpop.permute.xlu2 %1419 }
 0x2b8   :  { %1342 = vperm.xlu2 %1909, %v2643_v48  }
 0x2bb   :  { %1489 = vperm.xlu1 %1916, %v2643_v48   ;;  %v2068_v48 = vld [vmem:[#allocation4] sm:$0xff] }
 0x2be   :  { %v3079_v53 = vpop.permute.xlu1 %1468 }
 0x2bf   :  { %1918 = vset.pattern.permute.xlu0 %v3358_v3  ;;  %v1416_v0 = vpop.permute.xlu2 %1415 }
 0x2c0   :  { %1912 = vset.pattern.permute.xlu2 %v3357_v27 }
 0x2c1   :  { %1501 = vperm.xlu2 %1912, %v2067_v45  }
 0x2c6   :  { %v3082_v25 = vpop.permute.xlu1 %1411 }
 0x2c7   :  { %v3084_v57 = vpop.permute.xlu2 %1330 }
 0x2c9   :  { %1915 = vset.pattern.permute.xlu2 %v2142_v56 }
 0x2ca   :  { %1444 = vperm.xlu2 %1915, %v2661_v26  }
 0x2ce   :  { %v3086_v54 = vpop.permute.xlu1 %1517 }
 0x2cf   :  { %v1465_v56 = vpop.permute.xlu2 %1464 }
 0x2d2   :  { %1440 = vperm.xlu2 %1915, %v2068_v48  }
 0x2d6   :  { %v3088_v16 = vpop.permute.xlu1 %1407 }
 0x2da   :  { %1917 = vset.pattern.permute.xlu2 %v3358_v3 }
 0x2dc   :  { %v3090_v26 = vpop.permute.xlu2 %1326 }
 0x2de   :  { %v1323_v50 = vpop.permute.xlu1 %1322 }
 0x2e5   :  { %v3092_v22 = vpop.permute.xlu2 %1460 }
 0x2ee   :  { %v1351_v19 = vpop.permute.xlu2 %1350 }
 0x2ef   :  { %v1404_v58 = vpop.permute.xlu1 %1403 }
 0x2f1   :  { %v1400_v10 = vpop.permute.xlu0 %1399 }
 0x2f7   :  { %v3096_v55 = vpop.permute.xlu2 %1456 }
 0x2f8   :  { %v1319_v41 = vpop.permute.xlu1 %1318 }
 0x2f9   :  { %v1396_v47 = vpop.permute.xlu0 %1395 }
 0x300   :  { %v1347_v39 = vpop.permute.xlu2 %1346 }
 0x301   :  { %v1453_v33 = vpop.permute.xlu1 %1452 }
 0x302   :  { %v1335_v14 = vpop.permute.xlu0 %1334 }
 0x309   :  { %v3098_v40 = vpop.permute.xlu2 %1505 }
 0x30a   :  { %v1315_v42 = vpop.permute.xlu1 %1314  ;;  %v1311_v35 = vpop.permute.xlu0 %1310 }
 0x312   :  { %v1343_v37 = vpop.permute.xlu2 %1342 }
 0x313   :  { %v1449_v18 = vpop.permute.xlu1 %1448 }
 0x319   :  { %v1514_v27 = vpop.permute.xlu0 %1513 }
 0x31b   :  { %v1502_v21 = vpop.permute.xlu2 %1501 }
 0x31c   :  { %v1392_v63 = vpop.permute.xlu1 %1391 }
 0x321   :  { %v1510_v51 = vpop.permute.xlu0 %1509 }
 0x324   :  { %v1445_v15 = vpop.permute.xlu2 %1444 }
 0x325   :  { %v1498_v2 = vpop.permute.xlu1 %1497 }
 0x334   :  { %v1297_v59 = vpop.f32.mrf.mxu2 }
 0x335   :  { %v1298_v8 = vadd.f32 %v1297_v59, %v1276_v34 }
 0x337   :  { %v1300_v28 = vmul.f32 1.442695, %v1298_v8  ;;  %v3102_v23 = vadd.f32 %v1298_v8, %v891_v20  ;;  %v1304_v38 = vrot.slane %v1298_v8, 4  ;;  %v1490_v8 = vpop.permute.xlu1 %1489 }
 0x339   :  { %2019 = vpow2.f32 %v1300_v28 }
 0x33f   :  { %v2020_v43 = vpop.eup %2019 }
 0x340   :  { %v1302_v46 = vmul.f32 %v2020_v43, %v2523_v44 }
 0x342   :  { %v3105_v4 = vadd.f32 %v1304_v38, %v1302_v46 }
 0x344   :  { %v3108_v29 = vperm.slane %v3105_v4, 0  ;;  %v3111_v17 = vperm.slane %v3105_v4, 1  ;;  %v3114_v1 = vperm.slane %v3105_v4, 2  ;;  %v3117_v31 = vperm.slane %v3105_v4, 3 }
 0x346   :  { %v1374_v44 = vmul.f32 %v3108_v29, %v1343_v37  ;;  %v1423_v36 = vmul.f32 %v3111_v17, %v1392_v63  ;;  %v1377_v12 = vmul.f32 %v3108_v29, %v1355_v32  ;;  %v1426_v13 = vmul.f32 %v3111_v17, %v1404_v58  ;;  %v1494_v63 = vpop.permute.xlu0 %1493 }
 0x347   :  { %v1475_v11 = vmul.f32 %v3114_v1, %v1453_v33  ;;  %v1524_v52 = vmul.f32 %v3117_v31, %v1502_v21  ;;  %v1380_v61 = vmul.f32 %v3108_v29, %v1367_v6  ;;  %v1429_v62 = vmul.f32 %v3111_v17, %v1416_v0 }
 0x348   :  { %v1382_v60 = vadd.f32 %v1374_v44, %v1311_v35  ;;  %v1385_v45 = vadd.f32 %v1377_v12, %v1323_v50  ;;  %v1478_v3 = vmul.f32 %v3114_v1, %v1465_v56  ;;  %v1527_v48 = vmul.f32 %v3117_v31, %v1514_v27 }
 0x349   :  { %v1388_v34 = vadd.f32 %v1380_v61, %v1335_v14  ;;  %v1376_v37 = vmul.f32 %v3108_v29, %v1351_v19  ;;  %v1425_v32 = vmul.f32 %v3111_v17, %v1400_v10  ;;  %v1474_v58 = vmul.f32 %v3114_v1, %v1449_v18  ;;  %v1441_v18 = vpop.permute.xlu2 %1440 }
 0x34a   :  { %v1431_v33 = vadd.f32 %v1423_v36, %v1382_v60  ;;  %v1434_v59 = vadd.f32 %v1426_v13, %v1385_v45  ;;  %v1523_v20 = vmul.f32 %v3117_v31, %v1498_v2  ;;  %v1375_v6 = vmul.f32 %v3108_v29, %v1347_v39 }
 0x34b   :  { %v1437_v0 = vadd.f32 %v1429_v62, %v1388_v34  ;;  %v1384_v35 = vadd.f32 %v1376_v37, %v1319_v41  ;;  %v1424_v50 = vmul.f32 %v3111_v17, %v1396_v47  ;;  %v1473_v56 = vmul.f32 %v3114_v1, %v1445_v15 }
 0x34c   :  { %v1483_v14 = vadd.f32 %v1475_v11, %v1434_v59  ;;  %v1383_v28 = vadd.f32 %v1375_v6, %v1315_v42  ;;  %v1379_v19 = vmul.f32 %v3108_v29, %v3077_v9  ;;  %v1428_v10 = vmul.f32 %v3111_v17, %v3082_v25 }
 0x34d   :  { %v1486_v21 = vadd.f32 %v1478_v3, %v1437_v0  ;;  %v1433_v27 = vadd.f32 %v1425_v32, %v1384_v35  ;;  %v1477_v41 = vmul.f32 %v3114_v1, %v3092_v22  ;;  %v1526_v39 = vmul.f32 %v3117_v31, %v1510_v51 }
 0x34e   :  { %v1532_v47 = vadd.f32 %v1524_v52, %v1483_v14  ;;  %v1432_v43 = vadd.f32 %v1424_v50, %v1383_v28  ;;  %v1387_v46 = vadd.f32 %v1379_v19, %v3084_v57  ;;  %v1521_v42 = vmul.f32 %v3117_v31, %v1490_v8 }
 0x34f   :  { %v1535_v38 = vadd.f32 %v1527_v48, %v1486_v21  ;;  %v1482_v9 = vadd.f32 %v1474_v58, %v1433_v27  ;;  %v1472_v2 = vmul.f32 %v3114_v1, %v1441_v18  ;;  %v1522_v25 = vmul.f32 %v3117_v31, %v1494_v63  ;;  %v3186_v63 = vld [vmem:[#allocation4 + $0x58] sm:$0xff] }
 0x350   :  { %v1791_v15 = vmul.f32 -1.442695, %v1532_v47  ;;  %v1481_v44 = vadd.f32 %v1473_v56, %v1432_v43  ;;  %v1436_v36 = vadd.f32 %v1428_v10, %v1387_v46  ;;  %v1381_v22 = vmul.f32 %v3108_v29, %v3065_v49  ;;  %1691 = vperm.xlu2 %1917, %v3186_v63  }
 0x351   :  { %v1794_v12 = vmul.f32 -1.442695, %v1535_v38  ;;  %v1531_v51 = vadd.f32 %v1523_v20, %v1482_v9  ;;  %v1480_v13 = vadd.f32 %v1472_v2, %v1431_v33  ;;  %v1430_v57 = vmul.f32 %v3111_v17, %v3075_v7 }
 0x352   :  { %2021 = vpow2.f32 %v1791_v15  ;;  %v1485_v11 = vadd.f32 %v1477_v41, %v1436_v36  ;;  %v1530_v52 = vadd.f32 %v1522_v25, %v1481_v44  ;;  %v1389_v61 = vadd.f32 %v1381_v22, %v3070_v30 }
 0x353   :  { %2023 = vpow2.f32 %v1794_v12  ;;  %v1790_v62 = vmul.f32 -1.442695, %v1531_v51  ;;  %v1529_v60 = vadd.f32 %v1521_v42, %v1480_v13  ;;  %v1479_v49 = vmul.f32 %v3114_v1, %v3079_v53 }
 0x354   :  { %v1534_v45 = vadd.f32 %v1526_v39, %v1485_v11  ;;  %v1789_v3 = vmul.f32 -1.442695, %v1530_v52  ;;  %v1438_v48 = vadd.f32 %v1430_v57, %v1389_v61  ;;  %v1378_v34 = vmul.f32 %v3108_v29, %v3094_v5 }
 0x355   :  { %2025 = vpow2.f32 %v1790_v62  ;;  %v1528_v32 = vmul.f32 %v3117_v31, %v3086_v54  ;;  %v1788_v58 = vmul.f32 -1.442695, %v1529_v60  ;;  %v1427_v33 = vmul.f32 %v3111_v17, %v3088_v16 }
 0x356   :  { %v1793_v37 = vmul.f32 -1.442695, %v1534_v45  ;;  %v1487_v7 = vadd.f32 %v1479_v49, %v1438_v48  ;;  %2027 = vpow2.f32 %v1789_v3  ;;  %v1386_v30 = vadd.f32 %v1378_v34, %v3090_v26 }
 0x357   :  { %v1476_v5 = vmul.f32 %v3114_v1, %v3096_v55  ;;  %v1525_v35 = vmul.f32 %v3117_v31, %v3098_v40 }
 0x358   :  { %v2022_v59 = vpop.eup %2021  ;;  %2029 = vpow2.f32 %v1793_v37  ;;  %v1536_v20 = vadd.f32 %v1528_v32, %v1487_v7  ;;  %v1435_v6 = vadd.f32 %v1427_v33, %v1386_v30 }
 0x359   :  { %v2024_v53 = vpop.eup %2023  ;;  %2031 = vpow2.f32 %v1788_v58  ;;  %v3167_v50 = vadd.f32 1.0, %v2022_v59 }
 0x35a   :  { %v3163_v29 = vadd.f32 1.0, %v2024_v53  ;;  %v1795_v0 = vmul.f32 -1.442695, %v1536_v20  ;;  %v1484_v54 = vadd.f32 %v1476_v5, %v1435_v6  ;;  %v1725_v53 = vmul.f32 %v3105_v4, %v3105_v4 }
 0x35b   :  { %v2026_v26 = vpop.eup %2025  ;;  %v1623_v44 = vand.u32 2147483647, %v3167_v50  ;;  %v1625_v11 = vand.u32 2147483648, %v3167_v50  ;;  %vm1619_vm11 = vweird.f32 %v3167_v50 }
 0x35c   :  { %2033 = vrcp.f32 %v3163_v29  ;;  %v2028_v16 = vpop.eup %2027  ;;  %v1533_v17 = vadd.f32 %v1525_v35, %v1484_v54  ;;  %v3170_v8 = vadd.f32 1.0, %v2026_v26  ;;  %v1670_v46 = vand.u32 2147483648, %v3163_v29 }
 0x35d   :  { %2035 = vpow2.f32 %v1795_v0  ;;  %v3176_v40 = vadd.f32 1.0, %v2028_v16  ;;  %v1668_v2 = vand.u32 2147483647, %v3163_v29  ;;  %vm1664_vm5 = vweird.f32 %v3163_v29 }
 0x35e   :  { %v2030_v56 = vpop.eup %2029  ;;  %v1792_v1 = vmul.f32 -1.442695, %v1533_v17  ;;  %2037 = vrcp.f32 %v3167_v50  ;;  %v1671_v51 = vor.u32 1.1754944e-38, %v1670_v46  ;;  %v1608_v52 = vand.u32 2147483647, %v3170_v8 }
 0x35f   :  { %v3172_v55 = vadd.f32 1.0, %v2030_v56  ;;  %v2032_v14 = vpop.eup %2031  ;;  %vm3217_vm7 = vcmp.eq.f32.partialorder %v1668_v2, 8.507059e+37  ;;  %vm1604_vm14 = vweird.f32 %v3170_v8  ;;  %vm3246_vm15 = vcmp.eq.f32.partialorder %v1623_v44, 8.507059e+37 }
 0x360   :  { %v3181_v19 = vadd.f32 1.0, %v2032_v14 }
 0x361   :  { %2039 = vrcp.f32 %v3172_v55  ;;  %vm1649_vm6 = vweird.f32 %v3172_v55  ;;  %v1653_v45 = vand.u32 2147483647, %v3172_v55  ;;  %v1655_v30 = vand.u32 2147483648, %v3172_v55 }
 0x362   :  { %v3178_v31 = vpop.eup %2033  ;;  %2041 = vpow2.f32 %v1792_v1 }
 0x363   :  { %v2036_v28 = vpop.eup %2035  ;;  %2043 = vrcp.f32 %v3170_v8  ;;  %v1660_v18 = vmul.f32 %v3178_v31, %v3163_v29  ;;  %vm1665_vm8 = vweird.f32 %v3178_v31 }
 0x364   :  { %v1568_v10 = vadd.f32 1.0, %v2036_v28  ;;  %2045 = vrcp.f32 %v3176_v40  ;;  %v3188_v21 = vpop.eup %2037  ;;  %vm3235_vm13 = vmor %vm1664_vm5, %vm1665_vm8  ;;  %vm1654_vm8 = vcmp.eq.f32.partialorder %v1653_v45, 8.507059e+37 }
 0x365   :  { %v1661_v43 = vsub.f32 1.0, %v1660_v18  ;;  %v1615_v38 = vmul.f32 %v3188_v21, %v3167_v50  ;;  %vm1620_vm3 = vweird.f32 %v3188_v21 }
 0x366   :  { %2047 = vrcp.f32 %v1568_v10  ;;  %v1683_v48 = vand.u32 2147483647, %v1568_v10  ;;  %v1685_v49 = vand.u32 2147483648, %v1568_v10  ;;  %vm1679_vm10 = vweird.f32 %v1568_v10 }
 0x367   :  { %v3191_v27 = vpop.eup %2039  ;;  %2049 = vrcp.f32 %v3181_v19  ;;  %v1662_v12 = vmul.f32 %v3178_v31, %v1661_v43  ;;  %v1616_v57 = vsub.f32 1.0, %v1615_v38 }
 0x368   :  { %v2042_v41 = vpop.eup %2041  ;;  %v1645_v39 = vmul.f32 %v3191_v27, %v3172_v55  ;;  %vm1650_vm12 = vweird.f32 %v3191_v27  ;;  %vm1684_vm2 = vcmp.eq.f32.partialorder %v1683_v48, 8.507059e+37  ;;  %v1686_v0 = vor.u32 1.1754944e-38, %v1685_v49 }
 0x369   :  { %v3196_v47 = vpop.eup %2043  ;;  %v3199_v42 = vadd.f32 1.0, %v2042_v41  ;;  %v1663_v32 = vadd.f32 %v3178_v31, %v1662_v12  ;;  %v1617_v59 = vmul.f32 %v3188_v21, %v1616_v57  ;;  %vm3253_vm4 = vmor %vm1649_vm6, %vm1650_vm12  ;;  %v1626_v12 = vor.u32 1.1754944e-38, %v1625_v11 }
 0x36a   :  { %v3203_v9 = vpop.eup %2045  ;;  %v1646_v25 = vsub.f32 1.0, %v1645_v39  ;;  %v1600_v36 = vmul.f32 %v3196_v47, %v3170_v8  ;;  %v1656_v39 = vor.u32 1.1754944e-38, %v1655_v30  ;;  %v1595_v57 = vand.u32 2147483648, %v3176_v40 }
 0x36b   :  { %2051 = vrcp.f32 %v3199_v42  ;;  %v1585_v3 = vmul.f32 %v3203_v9, %v3176_v40  ;;  %v1667_v29 = vsel %vm3235_vm13, %v3178_v31, %v1663_v32  ;;  %v1640_v28 = vand.u32 2147483648, %v3199_v42 }
 0x36c   :  { %v2048_v15 = vpop.eup %2047  ;;  %v1647_v60 = vmul.f32 %v3191_v27, %v1646_v25  ;;  %v1601_v34 = vsub.f32 1.0, %v1600_v36  ;;  %v1618_v18 = vadd.f32 %v3188_v21, %v1617_v59  ;;  %v1672_v55 = vsel %vm3217_vm7, %v1671_v51, %v1667_v29  ;;  %vm3274_vm7 = vmor %vm1619_vm11, %vm1620_vm3 }
 0x36d   :  { %v1675_v22 = vmul.f32 %v2048_v15, %v1568_v10  ;;  %v3212_v13 = vpop.eup %2049  ;;  %vm1680_vm9 = vweird.f32 %v2048_v15  ;;  %v1586_v5 = vsub.f32 1.0, %v1585_v3  ;;  %v1638_v10 = vand.u32 2147483647, %v3199_v42 }
 0x36e   :  { %v1570_v58 = vmul.f32 %v3212_v13, %v3181_v19  ;;  %v1648_v6 = vadd.f32 %v3191_v27, %v1647_v60  ;;  %vm1681_vm1 = vmor %vm1679_vm10, %vm1680_vm9  ;;  %v1602_v16 = vmul.f32 %v3196_v47, %v1601_v34  ;;  %vm1634_vm6 = vweird.f32 %v3199_v42 }
 0x36f   :  { %v1676_v61 = vsub.f32 1.0, %v1675_v22  ;;  %v1587_v41 = vmul.f32 %v3203_v9, %v1586_v5  ;;  %vm1605_vm10 = vweird.f32 %v3196_v47  ;;  %v1641_v25 = vor.u32 1.1754944e-38, %v1640_v28 }
 0x370   :  { %v1571_v17 = vsub.f32 1.0, %v1570_v58  ;;  %v1652_v31 = vsel %vm3253_vm4, %v3191_v27, %v1648_v6  ;;  %v1603_v46 = vadd.f32 %v3196_v47, %v1602_v16  ;;  %vm1639_vm13 = vcmp.eq.f32.partialorder %v1638_v10, 8.507059e+37  ;;  %vm3288_vm11 = vmor %vm1604_vm14, %vm1605_vm10 }
 0x371   :  { %v2052_v37 = vpop.eup %2051  ;;  %v1677_v7 = vmul.f32 %v2048_v15, %v1676_v61  ;;  %v1657_v38 = vsel %vm1654_vm8, %v1656_v39, %v1652_v31  ;;  %v1622_v44 = vsel %vm3274_vm7, %v3188_v21, %v1618_v18  ;;  %v1588_v36 = vadd.f32 %v3203_v9, %v1587_v41 }
 0x372   :  { %v1630_v33 = vmul.f32 %v2052_v37, %v3199_v42  ;;  %vm1635_vm5 = vweird.f32 %v2052_v37  ;;  %v1572_v27 = vmul.f32 %v3212_v13, %v1571_v17  ;;  %v1610_v42 = vand.u32 2147483648, %v3170_v8 }
 0x373   :  { %v1678_v20 = vadd.f32 %v2048_v15, %v1677_v7  ;;  %vm1636_vm9 = vmor %vm1634_vm6, %vm1635_vm5  ;;  %vm1590_vm12 = vweird.f32 %v3203_v9  ;;  %v1607_v21 = vsel %vm3288_vm11, %v3196_v47, %v1603_v46  ;;  %v1593_v61 = vand.u32 2147483647, %v3176_v40 }
 0x374   :  { %v1631_v54 = vsub.f32 1.0, %v1630_v33  ;;  %v1573_v50 = vadd.f32 %v3212_v13, %v1572_v27  ;;  %v1627_v11 = vsel %vm3246_vm15, %v1626_v12, %v1622_v44  ;;  %v1611_v62 = vor.u32 1.1754944e-38, %v1610_v42 }
 0x375   :  { %v1682_v35 = vsel %vm1681_vm1, %v2048_v15, %v1678_v20  ;;  %vm1589_vm1 = vweird.f32 %v3176_v40  ;;  %v1580_v60 = vand.u32 2147483648, %v3181_v19  ;;  %vm1609_vm3 = vcmp.eq.f32.partialorder %v1608_v52, 8.507059e+37 }
 0x376   :  { %v1687_v56 = vsel %vm1684_vm2, %v1686_v0, %v1682_v35  ;;  %v1632_v14 = vmul.f32 %v2052_v37, %v1631_v54  ;;  %vm1575_vm2 = vweird.f32 %v3212_v13  ;;  %vm1591_vm14 = vmor %vm1589_vm1, %vm1590_vm12  ;;  %vm1574_vm4 = vweird.f32 %v3181_v19 }
 0x377   :  { %1704 = vmatpush.msra.mxu3 %v1687_v56  ;;  %v1592_v45 = vsel %vm1591_vm14, %v3203_v9, %v1588_v36  ;;  %v1578_v40 = vand.u32 2147483647, %v3181_v19  ;;  %v1612_v47 = vsel %vm1609_vm3, %v1611_v62, %v1607_v21  ;;  %v1596_v3 = vor.u32 1.1754944e-38, %v1595_v57  ;;  %vm1576_vm5 = vmor %vm1574_vm4, %vm1575_vm2 }
 0x378   :  { %v1633_v43 = vadd.f32 %v2052_v37, %v1632_v14  ;;  %vm1594_vm6 = vcmp.eq.f32.partialorder %v1593_v61, 8.507059e+37  ;;  %v1577_v48 = vsel %vm1576_vm5, %v3212_v13, %v1573_v50  ;;  %v1581_v34 = vor.u32 1.1754944e-38, %v1580_v60 }
 0x379   :  { %1705 = vmatpush.msra.mxu3 %v1672_v55  ;;  %v1597_v49 = vsel %vm1594_vm6, %v1596_v3, %v1592_v45  ;;  %vm1579_vm15 = vcmp.eq.f32.partialorder %v1578_v40, 8.507059e+37  ;;  %vm1727_vm8 = vcmask 125952   ;;  %v1745_v59 = vrot.slane %v3105_v4, 4 }
 0x37a   :  { %v1637_v2 = vsel %vm1636_vm9, %v2052_v37, %v1633_v43  ;;  %v1582_v37 = vsel %vm1579_vm15, %v1581_v34, %v1577_v48  ;;  %vm1747_vm9 = vcmask 1043456   ;;  %vm1751_vm10 = vcmask 130048  }
 0x37b   :  { %1706 = vmatpush.msra.mxu3 %v1657_v38  ;;  %v1642_v22 = vsel %vm1639_vm13, %v1641_v25, %v1637_v2  ;;  %vm1753_vm7 = vcmask 123904  }
 0x37d   :  { %1707 = vmatpush.msra.mxu3 %v1642_v22 }
 0x37f   :  { %1708 = vmatpush.msra.mxu3 %v1627_v11 }
 0x381   :  { %1709 = vmatpush.msra.mxu3 %v1612_v47 }
 0x383   :  { %1710 = vmatpush.msra.mxu3 %v1597_v49 }
 0x385   :  { %1711 = vmatpush.msra.mxu3 %v1582_v37 }
 0x386   :  { %1796 = vmatmul.msk.f32.vlgmr.msra.gmra.mxu3 %vm445_vm0, %v3186_v63  ;;  %vm1749_vm0 = vcmask 1040384  }
 0x3aa   :  { %v1692_v8 = vpop.permute.xlu2 %1691 }
 0x409   :  { %v1713_v9 = vpop.f32.mrf.mxu3 }
 0x40a   :  { %v1714_v52 = vadd.f32 %v1713_v9, %v1692_v8 }
 0x40c   :  { %v1716_v19 = vmul.f32 1.442695, %v1714_v52  ;;  %v1723_v7 = vadd.f32 %v1714_v52, %v3102_v23  ;;  %v1720_v58 = vrot.slane %v1714_v52, 4 }
 0x40e   :  { %2053 = vpow2.f32 %v1716_v19  ;;  %v1737_v30 = vsel %vm1727_vm8, %v1723_v7, 0.0 }
 0x40f   :  { %v1738_v63 = vrot.slane %v1737_v30, 4 }
 0x414   :  { %v2054_v32 = vpop.eup %2053 }
 0x415   :  { %v1718_v13 = vmul.f32 %v2054_v32, %v2836_v24  ;;  %v1739_v24 = vadd.f32 %v1738_v63, %v1737_v30 }
 0x417   :  { %v1722_v33 = vadd.f32 %v1720_v58, %v1718_v13  ;;  %v1740_v35 = vrot.slane %v1739_v24, 2 }
 0x419   :  { %v1724_v20 = vmul.f32 %v1722_v33, %v1722_v33  ;;  %v1748_v6 = vsel %vm1747_vm9, %v1722_v33, %v1745_v59  ;;  %v1741_v16 = vadd.f32 %v1740_v35, %v1739_v24 }
 0x41a   :  { %1752 = vst.msk [vmem:[%s3326_s2] sm:$0xff] %vm1751_vm10, %v1748_v6 }
 0x41b   :  { %v1726_v23 = vadd.f32 %v1725_v53, %v1724_v20  ;;  %v1742_v1 = vrot.slane %v1741_v16, 1 }
 0x41d   :  { %v1728_v5 = vsel %vm1727_vm8, %v1726_v23, 0.0  ;;  %v1743_v28 = vadd.f32 %v1742_v1, %v1741_v16 }
 0x41e   :  { %v1729_v0 = vrot.slane %v1728_v5, 4 }
 0x420   :  { %v1730_v54 = vadd.f32 %v1729_v0, %v1728_v5 }
 0x422   :  { %v1731_v29 = vrot.slane %v1730_v54, 2 }
 0x424   :  { %v1732_v26 = vadd.f32 %v1731_v29, %v1730_v54 }
 0x426   :  { %v1733_v17 = vrot.slane %v1732_v26, 1 }
 0x428   :  { %v1734_v56 = vadd.f32 %v1733_v17, %v1732_v26 }
 0x42a   :  { %v1735_v14 = vmul.f32 -0.5, %v1734_v56 }
 0x42c   :  { %v1797_v4 = vadd.f32 -7.351508, %v1735_v14 }
 0x42e   :  { %v1750_v31 = vsel %vm1749_vm0, %v1797_v4, %v1743_v28 }
 0x42f   :  { %1754 = vst.msk [vmem:[%s3326_s2 + $0x8] sm:$0x3] %vm1753_vm7, %v1750_v31 }
 0x430   :  { %1759 = vsyncpa [#allocation3], 1 }
 0x431   :  { %1760 = vsyncpa [#allocation5], 1 }

</bundles_post_ra>
